<compile_context>
chip_gen: v7x
topology: tpu7x:2x2x1
jax: 0.10.0
libtpu: 0.0.40
codegen_flags: <defaults>
</compile_context>

<pallas_src>
import jax
import jax.numpy as jnp
from jax.experimental import pallas as pl
from jax.experimental.pallas import tpu as pltpu

# ---------------- model sizes (small, consistent with the module) ----------
B = 2            # batch
L_SRC = 8        # source sequence length
IN_VOCAB = 20    # encoder vocab (pretrained embedding rows)
EMB = 16         # embedding dim
ENC_HID = 16     # encoder GRU hidden (per direction)
DEC_HID = 32     # decoder hidden (bridge fc output)
PAD_IDX = 0
F32 = jnp.float32
BF16 = jnp.bfloat16


# ---------------- fused encoder kernel --------------------------------------
def encoder_kernel(tok_ref, lens_ref,
                   ew_ref, bih_ref,      # fused emb_table@W_ih : [V,6H],[1,6H]
                   whh_ref, bhh_ref,     # block-diag hidden prj: [2H,6H],[1,6H]
                   fcw_ref, fcb_ref,     # bridge fc            : [2H,D],[1,D]
                   out_ref, hid_ref):
    L, Bk, H2 = out_ref.shape
    H = H2 // 2
    V = ew_ref.shape[0]
    LB = L * Bk

    # ---- fused embedding gather + input projections (both directions) -----
    # gi[t*B+b] = emb[text[t,b]] @ [W_ih_fwd | W_ih_bwd] + b_ih, computed as a
    # single bf16 one-hot matmul against the precomputed (emb_table @ W_ih).
    tok = tok_ref[...]                                              # [L*B,1] i32
    onehot = (jax.lax.broadcasted_iota(jnp.int32, (LB, V), 1)
              == tok).astype(BF16)                                  # [L*B,V]
    gi = (jnp.dot(onehot, ew_ref[...], preferred_element_type=F32)
          + bih_ref[...])                                           # [L*B,6H] f32

    # ---- packed-sequence validity masks, hoisted out of the recurrence ----
    # Fwd half (lanes 0:H) of loop step t uses time index t; bwd half
    # (lanes H:2H) uses time index L-1-t (backward direction starts at len-1).
    lens = lens_ref[...]                                            # [B,1] i32
    t_io = jax.lax.broadcasted_iota(jnp.int32, (L, Bk, H2), 0)
    lane = jax.lax.broadcasted_iota(jnp.int32, (L, Bk, H2), 2)
    t_eff = jnp.where(lane < H, t_io, (L - 1) - t_io)
    mask = t_eff < lens[None, :, :]                                 # [L,B,2H] bool

    whh = whh_ref[...]                                              # [2H,6H] bf16
    bhh = bhh_ref[...]                                              # [1,6H]  f32

    # state slab: h[:, 0:H] = forward hidden, h[:, H:2H] = backward hidden
    h = jnp.zeros((Bk, 2 * H), F32)

    # ---- both directions, one block-diagonal matmul per step (unrolled) ---
    for t in range(L):
        tb = L - 1 - t
        gi_f = gi[t * Bk:(t + 1) * Bk, :]      # fwd input gates, time t
        gi_b = gi[tb * Bk:(tb + 1) * Bk, :]    # bwd input gates, time L-1-t
        gh = jnp.dot(h.astype(BF16), whh,
                     preferred_element_type=F32) + bhh              # [B,6H]
        # forward gates (torch order r, z, n) -- f32 elementwise
        r_f = jax.nn.sigmoid(gi_f[:, 0:H] + gh[:, 0:H])
        z_f = jax.nn.sigmoid(gi_f[:, H:2 * H] + gh[:, H:2 * H])
        n_f = jnp.tanh(gi_f[:, 2 * H:3 * H] + r_f * gh[:, 2 * H:3 * H])
        hf_new = (1.0 - z_f) * n_f + z_f * h[:, 0:H]
        # backward gates
        r_b = jax.nn.sigmoid(gi_b[:, 3 * H:4 * H] + gh[:, 3 * H:4 * H])
        z_b = jax.nn.sigmoid(gi_b[:, 4 * H:5 * H] + gh[:, 4 * H:5 * H])
        n_b = jnp.tanh(gi_b[:, 5 * H:6 * H] + r_b * gh[:, 5 * H:6 * H])
        hb_new = (1.0 - z_b) * n_b + z_b * h[:, H:2 * H]

        h_new = jnp.concatenate([hf_new, hb_new], axis=-1)          # [B,2H]
        m = mask[t]
        h = jnp.where(m, h_new, h)             # freeze state past seq end
        step = jnp.where(m, h_new, 0.0)        # exact zeros at padded steps
        out_ref[t, :, 0:H] = step[:, 0:H]             # fwd output at time t
        out_ref[tb, :, H:2 * H] = step[:, H:2 * H]    # bwd output at time L-1-t

    # bridge: hidden = tanh(fc([h_fwd_final ; h_bwd_final])); the state slab
    # already IS the concatenation, so no lane concat here.
    hid_ref[...] = jnp.tanh(
        jnp.dot(h.astype(BF16), fcw_ref[...], preferred_element_type=F32)
        + fcb_ref[...])


# ---------------- pallas_call wrapper (whole arrays in VMEM, no grid) -------
_VMEM = pl.BlockSpec(memory_space=pltpu.MemorySpace.VMEM)

enc_call = pl.pallas_call(
    encoder_kernel,
    out_shape=(jax.ShapeDtypeStruct((L_SRC, B, 2 * ENC_HID), F32),  # outputs
               jax.ShapeDtypeStruct((B, DEC_HID), F32)),            # hidden
    in_specs=[_VMEM] * 8,
    out_specs=(_VMEM, _VMEM),
)


# ---------------- deterministic parameter init ------------------------------
def init_params(key):
    ks = jax.random.split(key, 12)
    w = lambda k, s: jax.random.normal(k, s, F32) * 0.1
    H, D, E = ENC_HID, DEC_HID, EMB
    return {
        'emb': w(ks[0], (IN_VOCAB, E)),                 # pretrained embedding
        # bidirectional GRU (forward / backward), gate order r, z, n
        'wf_ih': w(ks[1], (E, 3 * H)), 'wf_hh': w(ks[2], (H, 3 * H)),
        'bf_ih': w(ks[3], (1, 3 * H)), 'bf_hh': w(ks[4], (1, 3 * H)),
        'wb_ih': w(ks[5], (E, 3 * H)), 'wb_hh': w(ks[6], (H, 3 * H)),
        'bb_ih': w(ks[7], (1, 3 * H)), 'bb_hh': w(ks[8], (1, 3 * H)),
        # bridge fc: [2H] -> [D]
        'fc_w': w(ks[9], (2 * H, D)), 'fc_b': w(ks[10], (1, D)),
    }


def prepare_params(p):
    """One-time weight packing, OUTSIDE the per-call hot path."""
    H = ENC_HID
    # fold the embedding table into the packed input projection:
    # gi = onehot @ (emb_table @ [W_ih_fwd | W_ih_bwd])
    w_ih = jnp.concatenate([p['wf_ih'], p['wb_ih']], axis=1)          # [E,6H]
    ew = jnp.dot(p['emb'], w_ih)                                      # [V,6H]
    b_ih = jnp.concatenate([p['bf_ih'], p['bb_ih']], axis=1)          # [1,6H]
    # block-diagonal hidden projection: [hf|hb] @ W -> [fwd gates | bwd gates]
    w_hh = jnp.zeros((2 * H, 6 * H), F32)
    w_hh = w_hh.at[0:H, 0:3 * H].set(p['wf_hh'])
    w_hh = w_hh.at[H:2 * H, 3 * H:6 * H].set(p['wb_hh'])
    b_hh = jnp.concatenate([p['bf_hh'], p['bb_hh']], axis=1)          # [1,6H]
    return {'ew': ew.astype(BF16), 'b_ih': b_ih,
            'w_hh': w_hh.astype(BF16), 'b_hh': b_hh,
            'fc_w': p['fc_w'].astype(BF16), 'fc_b': p['fc_b']}


# ---------------- Encoder.forward equivalent (jitted) -----------------------
@jax.jit
def encoder_forward(prep, text, text_len):
    """text: [L, B] int32 (time-major, like the PyTorch module); text_len: [B]."""
    tokens = text.reshape(L_SRC * B, 1)          # row t*B + b  <->  (t, b)
    lens = text_len.reshape(B, 1)                # int32, no f32 cast
    return enc_call(tokens, lens, prep['ew'], prep['b_ih'],
                    prep['w_hh'], prep['b_hh'], prep['fc_w'], prep['fc_b'])


# ---------------- pure-JAX f32 reference (for validation) -------------------
def encoder_reference(params, text, text_len):
    hp = jax.lax.Precision.HIGHEST
    H = ENC_HID
    emb = jnp.take(params['emb'], text, axis=0)
    L, Bn, _ = emb.shape

    def cell(x, h, w_ih, w_hh, b_ih, b_hh):
        gi = jnp.dot(x, w_ih, precision=hp) + b_ih
        gh = jnp.dot(h, w_hh, precision=hp) + b_hh
        r = jax.nn.sigmoid(gi[:, 0:H] + gh[:, 0:H])
        z = jax.nn.sigmoid(gi[:, H:2 * H] + gh[:, H:2 * H])
        n = jnp.tanh(gi[:, 2 * H:3 * H] + r * gh[:, 2 * H:3 * H])
        return (1.0 - z) * n + z * h

    hf = jnp.zeros((Bn, H), F32)
    hb = jnp.zeros((Bn, H), F32)
    out_f = [None] * L
    out_b = [None] * L
    for t in range(L):
        v = (text_len > t)[:, None]
        hn = cell(emb[t], hf, params['wf_ih'], params['wf_hh'],
                  params['bf_ih'], params['bf_hh'])
        hf = jnp.where(v, hn, hf)
        out_f[t] = jnp.where(v, hn, 0.0)
    for i in range(L):
        t = L - 1 - i
        v = (text_len > t)[:, None]
        hn = cell(emb[t], hb, params['wb_ih'], params['wb_hh'],
                  params['bb_ih'], params['bb_hh'])
        hb = jnp.where(v, hn, hb)
        out_b[t] = jnp.where(v, hn, 0.0)
    outputs = jnp.concatenate(
        [jnp.stack(out_f, axis=0), jnp.stack(out_b, axis=0)], axis=-1)
    hidden = jnp.tanh(
        jnp.dot(jnp.concatenate([hf, hb], axis=1), params['fc_w'], precision=hp)
        + params['fc_b'])
    return outputs, hidden


if __name__ == "__main__":
    key = jax.random.PRNGKey(0)
    kp, kt = jax.random.split(key)
    params = init_params(kp)
    prep = prepare_params(params)

    # time-major tokens [L, B]; descending lengths (pack_padded_sequence
    # requires sorted lengths); padded positions hold PAD_IDX.
    text = jax.random.randint(kt, (L_SRC, B), 1, IN_VOCAB, dtype=jnp.int32)
    text_len = jnp.array([L_SRC, L_SRC - 2], dtype=jnp.int32)
    t_idx = jnp.arange(L_SRC, dtype=jnp.int32)[:, None]
    text = jnp.where(t_idx < text_len[None, :], text, PAD_IDX)

    outputs, hidden = encoder_forward(prep, text, text_len)
    outputs = jax.block_until_ready(outputs)
    hidden = jax.block_until_ready(hidden)

    assert outputs.shape == (L_SRC, B, 2 * ENC_HID)
    assert hidden.shape == (B, DEC_HID)
    assert bool(jnp.all(jnp.isfinite(outputs)))
    assert bool(jnp.all(jnp.isfinite(hidden)))
    # pad_packed_sequence semantics: padded time steps are exact zeros
    assert bool(jnp.all(outputs[int(text_len[1]):, 1, :] == 0.0))

    # validate against a pure-JAX f32 reference of the same recurrence
    # (kernel matmuls use bf16 operands with f32 accumulation)
    ref_out, ref_hid = encoder_reference(params, text, text_len)
    assert bool(jnp.allclose(outputs, ref_out, atol=1e-2, rtol=1e-2))
    assert bool(jnp.allclose(hidden, ref_hid, atol=1e-2, rtol=1e-2))

    print("KERNEL_OK")
</pallas_src>

<mosaic_0001>
module attributes {stable_mosaic.version = 11 : i64} {
  func.func @encoder_kernel(%arg0: memref<16x1xi32, #tpu.memory_space<vmem>>, %arg1: memref<2x1xi32, #tpu.memory_space<vmem>>, %arg2: memref<20x96xbf16, #tpu.memory_space<vmem>>, %arg3: memref<1x96xf32, #tpu.memory_space<vmem>>, %arg4: memref<32x96xbf16, #tpu.memory_space<vmem>>, %arg5: memref<1x96xf32, #tpu.memory_space<vmem>>, %arg6: memref<32x32xbf16, #tpu.memory_space<vmem>>, %arg7: memref<1x32xf32, #tpu.memory_space<vmem>>, %arg8: memref<8x2x32xf32, #tpu.memory_space<vmem>>, %arg9: memref<2x32xf32, #tpu.memory_space<vmem>>) attributes {dimension_semantics = [], scalar_prefetch = 0 : i64, scratch_operands = 0 : i64, tpu.core_type = #tpu.core_type<tc>} {
    %c0 = arith.constant 0 : index
    %c0_0 = arith.constant 0 : index
    %0 = vector.load %arg0[%c0, %c0_0] : memref<16x1xi32, #tpu.memory_space<vmem>>, vector<16x1xi32>
    %1 = tpu.iota {dimensions = array<i32: 1>} : vector<16x20xi32>
    %2 = vector.broadcast %0 : vector<16x1xi32> to vector<16x20xi32>
    %3 = arith.cmpi eq, %1, %2 : vector<16x20xi32>
    %4 = arith.extui %3 : vector<16x20xi1> to vector<16x20xi32>
    %5 = arith.sitofp %4 : vector<16x20xi32> to vector<16x20xf32>
    %6 = arith.truncf %5 : vector<16x20xf32> to vector<16x20xbf16>
    %c0_1 = arith.constant 0 : index
    %c0_2 = arith.constant 0 : index
    %7 = vector.load %arg2[%c0_1, %c0_2] : memref<20x96xbf16, #tpu.memory_space<vmem>>, vector<20x96xbf16>
    %cst = arith.constant dense<0.000000e+00> : vector<16x96xf32>
    %8 = tpu.matmul %6, %7, %cst {dimension_numbers = #tpu.dot_dimension_numbers<[1], [0], [0], [1], [0, 0, 1, 1], [], []>} : vector<16x20xbf16>, vector<20x96xbf16>, vector<16x96xf32> -> vector<16x96xf32>
    %c0_3 = arith.constant 0 : index
    %c0_4 = arith.constant 0 : index
    %9 = vector.load %arg3[%c0_3, %c0_4] : memref<1x96xf32, #tpu.memory_space<vmem>>, vector<1x96xf32>
    %10 = vector.broadcast %9 : vector<1x96xf32> to vector<16x96xf32>
    %11 = arith.addf %8, %10 : vector<16x96xf32>
    %c0_5 = arith.constant 0 : index
    %c0_6 = arith.constant 0 : index
    %12 = vector.load %arg1[%c0_5, %c0_6] : memref<2x1xi32, #tpu.memory_space<vmem>>, vector<2x1xi32>
    %13 = tpu.iota {dimensions = array<i32: 0>} : vector<8x2x32xi32>
    %14 = tpu.iota {dimensions = array<i32: 2>} : vector<8x2x32xi32>
    %c16_i32 = arith.constant 16 : i32
    %15 = vector.broadcast %c16_i32 : i32 to vector<8x2x32xi32>
    %16 = arith.cmpi slt, %14, %15 : vector<8x2x32xi32>
    %c7_i32 = arith.constant 7 : i32
    %17 = vector.broadcast %c7_i32 : i32 to vector<8x2x32xi32>
    %18 = arith.subi %17, %13 : vector<8x2x32xi32>
    %19 = arith.select %16, %13, %18 : vector<8x2x32xi1>, vector<8x2x32xi32>
    %20 = vector.shape_cast %12 : vector<2x1xi32> to vector<1x2x1xi32>
    %21 = vector.broadcast %20 : vector<1x2x1xi32> to vector<8x2x32xi32>
    %22 = arith.cmpi slt, %19, %21 : vector<8x2x32xi32>
    %c0_7 = arith.constant 0 : index
    %c0_8 = arith.constant 0 : index
    %23 = vector.load %arg4[%c0_7, %c0_8] : memref<32x96xbf16, #tpu.memory_space<vmem>>, vector<32x96xbf16>
    %c0_9 = arith.constant 0 : index
    %c0_10 = arith.constant 0 : index
    %24 = vector.load %arg5[%c0_9, %c0_10] : memref<1x96xf32, #tpu.memory_space<vmem>>, vector<1x96xf32>
    %cst_11 = arith.constant 0.000000e+00 : f32
    %25 = vector.broadcast %cst_11 : f32 to vector<2x32xf32>
    %26 = vector.extract_strided_slice %11 {offsets = [0, 0], sizes = [2, 96], strides = [1, 1]} : vector<16x96xf32> to vector<2x96xf32>
    %27 = vector.extract_strided_slice %11 {offsets = [14, 0], sizes = [2, 96], strides = [1, 1]} : vector<16x96xf32> to vector<2x96xf32>
    %28 = arith.truncf %25 : vector<2x32xf32> to vector<2x32xbf16>
    %cst_12 = arith.constant dense<0.000000e+00> : vector<2x96xf32>
    %29 = tpu.matmul %28, %23, %cst_12 {dimension_numbers = #tpu.dot_dimension_numbers<[1], [0], [0], [1], [0, 0, 1, 1], [], []>} : vector<2x32xbf16>, vector<32x96xbf16>, vector<2x96xf32> -> vector<2x96xf32>
    %30 = vector.broadcast %24 : vector<1x96xf32> to vector<2x96xf32>
    %31 = arith.addf %29, %30 : vector<2x96xf32>
    %32 = vector.extract_strided_slice %26 {offsets = [0, 0], sizes = [2, 16], strides = [1, 1]} : vector<2x96xf32> to vector<2x16xf32>
    %33 = vector.extract_strided_slice %31 {offsets = [0, 0], sizes = [2, 16], strides = [1, 1]} : vector<2x96xf32> to vector<2x16xf32>
    %34 = arith.addf %32, %33 : vector<2x16xf32>
    %35 = arith.negf %34 : vector<2x16xf32>
    %36 = math.exp %35 : vector<2x16xf32>
    %cst_13 = arith.constant 1.000000e+00 : f32
    %37 = vector.broadcast %cst_13 : f32 to vector<2x16xf32>
    %38 = arith.addf %37, %36 : vector<2x16xf32>
    %39 = arith.divf %37, %38 : vector<2x16xf32>
    %40 = vector.extract_strided_slice %26 {offsets = [0, 16], sizes = [2, 16], strides = [1, 1]} : vector<2x96xf32> to vector<2x16xf32>
    %41 = vector.extract_strided_slice %31 {offsets = [0, 16], sizes = [2, 16], strides = [1, 1]} : vector<2x96xf32> to vector<2x16xf32>
    %42 = arith.addf %40, %41 : vector<2x16xf32>
    %43 = arith.negf %42 : vector<2x16xf32>
    %44 = math.exp %43 : vector<2x16xf32>
    %cst_14 = arith.constant 1.000000e+00 : f32
    %45 = vector.broadcast %cst_14 : f32 to vector<2x16xf32>
    %46 = arith.addf %45, %44 : vector<2x16xf32>
    %47 = arith.divf %45, %46 : vector<2x16xf32>
    %48 = vector.extract_strided_slice %26 {offsets = [0, 32], sizes = [2, 16], strides = [1, 1]} : vector<2x96xf32> to vector<2x16xf32>
    %49 = vector.extract_strided_slice %31 {offsets = [0, 32], sizes = [2, 16], strides = [1, 1]} : vector<2x96xf32> to vector<2x16xf32>
    %50 = arith.mulf %39, %49 : vector<2x16xf32>
    %51 = arith.addf %48, %50 : vector<2x16xf32>
    %52 = math.tanh %51 : vector<2x16xf32>
    %cst_15 = arith.constant 1.000000e+00 : f32
    %53 = vector.broadcast %cst_15 : f32 to vector<2x16xf32>
    %54 = arith.subf %53, %47 : vector<2x16xf32>
    %55 = arith.mulf %54, %52 : vector<2x16xf32>
    %56 = vector.extract_strided_slice %25 {offsets = [0, 0], sizes = [2, 16], strides = [1, 1]} : vector<2x32xf32> to vector<2x16xf32>
    %57 = arith.mulf %47, %56 : vector<2x16xf32>
    %58 = arith.addf %55, %57 : vector<2x16xf32>
    %59 = vector.extract_strided_slice %27 {offsets = [0, 48], sizes = [2, 16], strides = [1, 1]} : vector<2x96xf32> to vector<2x16xf32>
    %60 = vector.extract_strided_slice %31 {offsets = [0, 48], sizes = [2, 16], strides = [1, 1]} : vector<2x96xf32> to vector<2x16xf32>
    %61 = arith.addf %59, %60 : vector<2x16xf32>
    %62 = arith.negf %61 : vector<2x16xf32>
    %63 = math.exp %62 : vector<2x16xf32>
    %cst_16 = arith.constant 1.000000e+00 : f32
    %64 = vector.broadcast %cst_16 : f32 to vector<2x16xf32>
    %65 = arith.addf %64, %63 : vector<2x16xf32>
    %66 = arith.divf %64, %65 : vector<2x16xf32>
    %67 = vector.extract_strided_slice %27 {offsets = [0, 64], sizes = [2, 16], strides = [1, 1]} : vector<2x96xf32> to vector<2x16xf32>
    %68 = vector.extract_strided_slice %31 {offsets = [0, 64], sizes = [2, 16], strides = [1, 1]} : vector<2x96xf32> to vector<2x16xf32>
    %69 = arith.addf %67, %68 : vector<2x16xf32>
    %70 = arith.negf %69 : vector<2x16xf32>
    %71 = math.exp %70 : vector<2x16xf32>
    %cst_17 = arith.constant 1.000000e+00 : f32
    %72 = vector.broadcast %cst_17 : f32 to vector<2x16xf32>
    %73 = arith.addf %72, %71 : vector<2x16xf32>
    %74 = arith.divf %72, %73 : vector<2x16xf32>
    %75 = vector.extract_strided_slice %27 {offsets = [0, 80], sizes = [2, 16], strides = [1, 1]} : vector<2x96xf32> to vector<2x16xf32>
    %76 = vector.extract_strided_slice %31 {offsets = [0, 80], sizes = [2, 16], strides = [1, 1]} : vector<2x96xf32> to vector<2x16xf32>
    %77 = arith.mulf %66, %76 : vector<2x16xf32>
    %78 = arith.addf %75, %77 : vector<2x16xf32>
    %79 = math.tanh %78 : vector<2x16xf32>
    %cst_18 = arith.constant 1.000000e+00 : f32
    %80 = vector.broadcast %cst_18 : f32 to vector<2x16xf32>
    %81 = arith.subf %80, %74 : vector<2x16xf32>
    %82 = arith.mulf %81, %79 : vector<2x16xf32>
    %83 = vector.extract_strided_slice %25 {offsets = [0, 16], sizes = [2, 16], strides = [1, 1]} : vector<2x32xf32> to vector<2x16xf32>
    %84 = arith.mulf %74, %83 : vector<2x16xf32>
    %85 = arith.addf %82, %84 : vector<2x16xf32>
    %86 = tpu.concatenate %58, %85 in 1 : vector<2x16xf32>, vector<2x16xf32> -> vector<2x32xf32>
    %87 = vector.extract_strided_slice %22 {offsets = [0, 0, 0], sizes = [1, 2, 32], strides = [1, 1, 1]} : vector<8x2x32xi1> to vector<1x2x32xi1>
    %88 = vector.shape_cast %87 : vector<1x2x32xi1> to vector<2x32xi1>
    %89 = arith.select %88, %86, %25 : vector<2x32xi1>, vector<2x32xf32>
    %cst_19 = arith.constant 0.000000e+00 : f32
    %90 = vector.broadcast %cst_19 : f32 to vector<2x32xf32>
    %91 = arith.select %88, %86, %90 : vector<2x32xi1>, vector<2x32xf32>
    %92 = vector.extract_strided_slice %91 {offsets = [0, 0], sizes = [2, 16], strides = [1, 1]} : vector<2x32xf32> to vector<2x16xf32>
    %c0_20 = arith.constant 0 : index
    %c0_21 = arith.constant 0 : index
    %c0_22 = arith.constant 0 : index
    %93 = vector.load %arg8[%c0_20, %c0_21, %c0_22] : memref<8x2x32xf32, #tpu.memory_space<vmem>>, vector<1x2x16xf32>
    %94 = vector.shape_cast %93 : vector<1x2x16xf32> to vector<2x16xf32>
    %95 = vector.shape_cast %92 : vector<2x16xf32> to vector<1x2x16xf32>
    tpu.vector_store %arg8[%c0_20, %c0_21, %c0_22], %95 {strides = array<i32>} : memref<8x2x32xf32, #tpu.memory_space<vmem>>, vector<1x2x16xf32>,
    %96 = vector.extract_strided_slice %91 {offsets = [0, 16], sizes = [2, 16], strides = [1, 1]} : vector<2x32xf32> to vector<2x16xf32>
    %c7 = arith.constant 7 : index
    %c0_23 = arith.constant 0 : index
    %c16 = arith.constant 16 : index
    %97 = vector.load %arg8[%c7, %c0_23, %c16] : memref<8x2x32xf32, #tpu.memory_space<vmem>>, vector<1x2x16xf32>
    %98 = vector.shape_cast %97 : vector<1x2x16xf32> to vector<2x16xf32>
    %99 = vector.shape_cast %96 : vector<2x16xf32> to vector<1x2x16xf32>
    tpu.vector_store %arg8[%c7, %c0_23, %c16], %99 {strides = array<i32>} : memref<8x2x32xf32, #tpu.memory_space<vmem>>, vector<1x2x16xf32>,
    %100 = vector.extract_strided_slice %11 {offsets = [2, 0], sizes = [2, 96], strides = [1, 1]} : vector<16x96xf32> to vector<2x96xf32>
    %101 = vector.extract_strided_slice %11 {offsets = [12, 0], sizes = [2, 96], strides = [1, 1]} : vector<16x96xf32> to vector<2x96xf32>
    %102 = arith.truncf %89 : vector<2x32xf32> to vector<2x32xbf16>
    %cst_24 = arith.constant dense<0.000000e+00> : vector<2x96xf32>
    %103 = tpu.matmul %102, %23, %cst_24 {dimension_numbers = #tpu.dot_dimension_numbers<[1], [0], [0], [1], [0, 0, 1, 1], [], []>} : vector<2x32xbf16>, vector<32x96xbf16>, vector<2x96xf32> -> vector<2x96xf32>
    %104 = vector.broadcast %24 : vector<1x96xf32> to vector<2x96xf32>
    %105 = arith.addf %103, %104 : vector<2x96xf32>
    %106 = vector.extract_strided_slice %100 {offsets = [0, 0], sizes = [2, 16], strides = [1, 1]} : vector<2x96xf32> to vector<2x16xf32>
    %107 = vector.extract_strided_slice %105 {offsets = [0, 0], sizes = [2, 16], strides = [1, 1]} : vector<2x96xf32> to vector<2x16xf32>
    %108 = arith.addf %106, %107 : vector<2x16xf32>
    %109 = arith.negf %108 : vector<2x16xf32>
    %110 = math.exp %109 : vector<2x16xf32>
    %cst_25 = arith.constant 1.000000e+00 : f32
    %111 = vector.broadcast %cst_25 : f32 to vector<2x16xf32>
    %112 = arith.addf %111, %110 : vector<2x16xf32>
    %113 = arith.divf %111, %112 : vector<2x16xf32>
    %114 = vector.extract_strided_slice %100 {offsets = [0, 16], sizes = [2, 16], strides = [1, 1]} : vector<2x96xf32> to vector<2x16xf32>
    %115 = vector.extract_strided_slice %105 {offsets = [0, 16], sizes = [2, 16], strides = [1, 1]} : vector<2x96xf32> to vector<2x16xf32>
    %116 = arith.addf %114, %115 : vector<2x16xf32>
    %117 = arith.negf %116 : vector<2x16xf32>
    %118 = math.exp %117 : vector<2x16xf32>
    %cst_26 = arith.constant 1.000000e+00 : f32
    %119 = vector.broadcast %cst_26 : f32 to vector<2x16xf32>
    %120 = arith.addf %119, %118 : vector<2x16xf32>
    %121 = arith.divf %119, %120 : vector<2x16xf32>
    %122 = vector.extract_strided_slice %100 {offsets = [0, 32], sizes = [2, 16], strides = [1, 1]} : vector<2x96xf32> to vector<2x16xf32>
    %123 = vector.extract_strided_slice %105 {offsets = [0, 32], sizes = [2, 16], strides = [1, 1]} : vector<2x96xf32> to vector<2x16xf32>
    %124 = arith.mulf %113, %123 : vector<2x16xf32>
    %125 = arith.addf %122, %124 : vector<2x16xf32>
    %126 = math.tanh %125 : vector<2x16xf32>
    %cst_27 = arith.constant 1.000000e+00 : f32
    %127 = vector.broadcast %cst_27 : f32 to vector<2x16xf32>
    %128 = arith.subf %127, %121 : vector<2x16xf32>
    %129 = arith.mulf %128, %126 : vector<2x16xf32>
    %130 = vector.extract_strided_slice %89 {offsets = [0, 0], sizes = [2, 16], strides = [1, 1]} : vector<2x32xf32> to vector<2x16xf32>
    %131 = arith.mulf %121, %130 : vector<2x16xf32>
    %132 = arith.addf %129, %131 : vector<2x16xf32>
    %133 = vector.extract_strided_slice %101 {offsets = [0, 48], sizes = [2, 16], strides = [1, 1]} : vector<2x96xf32> to vector<2x16xf32>
    %134 = vector.extract_strided_slice %105 {offsets = [0, 48], sizes = [2, 16], strides = [1, 1]} : vector<2x96xf32> to vector<2x16xf32>
    %135 = arith.addf %133, %134 : vector<2x16xf32>
    %136 = arith.negf %135 : vector<2x16xf32>
    %137 = math.exp %136 : vector<2x16xf32>
    %cst_28 = arith.constant 1.000000e+00 : f32
    %138 = vector.broadcast %cst_28 : f32 to vector<2x16xf32>
    %139 = arith.addf %138, %137 : vector<2x16xf32>
    %140 = arith.divf %138, %139 : vector<2x16xf32>
    %141 = vector.extract_strided_slice %101 {offsets = [0, 64], sizes = [2, 16], strides = [1, 1]} : vector<2x96xf32> to vector<2x16xf32>
    %142 = vector.extract_strided_slice %105 {offsets = [0, 64], sizes = [2, 16], strides = [1, 1]} : vector<2x96xf32> to vector<2x16xf32>
    %143 = arith.addf %141, %142 : vector<2x16xf32>
    %144 = arith.negf %143 : vector<2x16xf32>
    %145 = math.exp %144 : vector<2x16xf32>
    %cst_29 = arith.constant 1.000000e+00 : f32
    %146 = vector.broadcast %cst_29 : f32 to vector<2x16xf32>
    %147 = arith.addf %146, %145 : vector<2x16xf32>
    %148 = arith.divf %146, %147 : vector<2x16xf32>
    %149 = vector.extract_strided_slice %101 {offsets = [0, 80], sizes = [2, 16], strides = [1, 1]} : vector<2x96xf32> to vector<2x16xf32>
    %150 = vector.extract_strided_slice %105 {offsets = [0, 80], sizes = [2, 16], strides = [1, 1]} : vector<2x96xf32> to vector<2x16xf32>
    %151 = arith.mulf %140, %150 : vector<2x16xf32>
    %152 = arith.addf %149, %151 : vector<2x16xf32>
    %153 = math.tanh %152 : vector<2x16xf32>
    %cst_30 = arith.constant 1.000000e+00 : f32
    %154 = vector.broadcast %cst_30 : f32 to vector<2x16xf32>
    %155 = arith.subf %154, %148 : vector<2x16xf32>
    %156 = arith.mulf %155, %153 : vector<2x16xf32>
    %157 = vector.extract_strided_slice %89 {offsets = [0, 16], sizes = [2, 16], strides = [1, 1]} : vector<2x32xf32> to vector<2x16xf32>
    %158 = arith.mulf %148, %157 : vector<2x16xf32>
    %159 = arith.addf %156, %158 : vector<2x16xf32>
    %160 = tpu.concatenate %132, %159 in 1 : vector<2x16xf32>, vector<2x16xf32> -> vector<2x32xf32>
    %161 = vector.extract_strided_slice %22 {offsets = [1, 0, 0], sizes = [1, 2, 32], strides = [1, 1, 1]} : vector<8x2x32xi1> to vector<1x2x32xi1>
    %162 = vector.shape_cast %161 : vector<1x2x32xi1> to vector<2x32xi1>
    %163 = arith.select %162, %160, %89 : vector<2x32xi1>, vector<2x32xf32>
    %cst_31 = arith.constant 0.000000e+00 : f32
    %164 = vector.broadcast %cst_31 : f32 to vector<2x32xf32>
    %165 = arith.select %162, %160, %164 : vector<2x32xi1>, vector<2x32xf32>
    %166 = vector.extract_strided_slice %165 {offsets = [0, 0], sizes = [2, 16], strides = [1, 1]} : vector<2x32xf32> to vector<2x16xf32>
    %c1 = arith.constant 1 : index
    %c0_32 = arith.constant 0 : index
    %c0_33 = arith.constant 0 : index
    %167 = vector.load %arg8[%c1, %c0_32, %c0_33] : memref<8x2x32xf32, #tpu.memory_space<vmem>>, vector<1x2x16xf32>
    %168 = vector.shape_cast %167 : vector<1x2x16xf32> to vector<2x16xf32>
    %169 = vector.shape_cast %166 : vector<2x16xf32> to vector<1x2x16xf32>
    tpu.vector_store %arg8[%c1, %c0_32, %c0_33], %169 {strides = array<i32>} : memref<8x2x32xf32, #tpu.memory_space<vmem>>, vector<1x2x16xf32>,
    %170 = vector.extract_strided_slice %165 {offsets = [0, 16], sizes = [2, 16], strides = [1, 1]} : vector<2x32xf32> to vector<2x16xf32>
    %c6 = arith.constant 6 : index
    %c0_34 = arith.constant 0 : index
    %c16_35 = arith.constant 16 : index
    %171 = vector.load %arg8[%c6, %c0_34, %c16_35] : memref<8x2x32xf32, #tpu.memory_space<vmem>>, vector<1x2x16xf32>
    %172 = vector.shape_cast %171 : vector<1x2x16xf32> to vector<2x16xf32>
    %173 = vector.shape_cast %170 : vector<2x16xf32> to vector<1x2x16xf32>
    tpu.vector_store %arg8[%c6, %c0_34, %c16_35], %173 {strides = array<i32>} : memref<8x2x32xf32, #tpu.memory_space<vmem>>, vector<1x2x16xf32>,
    %174 = vector.extract_strided_slice %11 {offsets = [4, 0], sizes = [2, 96], strides = [1, 1]} : vector<16x96xf32> to vector<2x96xf32>
    %175 = vector.extract_strided_slice %11 {offsets = [10, 0], sizes = [2, 96], strides = [1, 1]} : vector<16x96xf32> to vector<2x96xf32>
    %176 = arith.truncf %163 : vector<2x32xf32> to vector<2x32xbf16>
    %cst_36 = arith.constant dense<0.000000e+00> : vector<2x96xf32>
    %177 = tpu.matmul %176, %23, %cst_36 {dimension_numbers = #tpu.dot_dimension_numbers<[1], [0], [0], [1], [0, 0, 1, 1], [], []>} : vector<2x32xbf16>, vector<32x96xbf16>, vector<2x96xf32> -> vector<2x96xf32>
    %178 = vector.broadcast %24 : vector<1x96xf32> to vector<2x96xf32>
    %179 = arith.addf %177, %178 : vector<2x96xf32>
    %180 = vector.extract_strided_slice %174 {offsets = [0, 0], sizes = [2, 16], strides = [1, 1]} : vector<2x96xf32> to vector<2x16xf32>
    %181 = vector.extract_strided_slice %179 {offsets = [0, 0], sizes = [2, 16], strides = [1, 1]} : vector<2x96xf32> to vector<2x16xf32>
    %182 = arith.addf %180, %181 : vector<2x16xf32>
    %183 = arith.negf %182 : vector<2x16xf32>
    %184 = math.exp %183 : vector<2x16xf32>
    %cst_37 = arith.constant 1.000000e+00 : f32
    %185 = vector.broadcast %cst_37 : f32 to vector<2x16xf32>
    %186 = arith.addf %185, %184 : vector<2x16xf32>
    %187 = arith.divf %185, %186 : vector<2x16xf32>
    %188 = vector.extract_strided_slice %174 {offsets = [0, 16], sizes = [2, 16], strides = [1, 1]} : vector<2x96xf32> to vector<2x16xf32>
    %189 = vector.extract_strided_slice %179 {offsets = [0, 16], sizes = [2, 16], strides = [1, 1]} : vector<2x96xf32> to vector<2x16xf32>
    %190 = arith.addf %188, %189 : vector<2x16xf32>
    %191 = arith.negf %190 : vector<2x16xf32>
    %192 = math.exp %191 : vector<2x16xf32>
    %cst_38 = arith.constant 1.000000e+00 : f32
    %193 = vector.broadcast %cst_38 : f32 to vector<2x16xf32>
    %194 = arith.addf %193, %192 : vector<2x16xf32>
    %195 = arith.divf %193, %194 : vector<2x16xf32>
    %196 = vector.extract_strided_slice %174 {offsets = [0, 32], sizes = [2, 16], strides = [1, 1]} : vector<2x96xf32> to vector<2x16xf32>
    %197 = vector.extract_strided_slice %179 {offsets = [0, 32], sizes = [2, 16], strides = [1, 1]} : vector<2x96xf32> to vector<2x16xf32>
    %198 = arith.mulf %187, %197 : vector<2x16xf32>
    %199 = arith.addf %196, %198 : vector<2x16xf32>
    %200 = math.tanh %199 : vector<2x16xf32>
    %cst_39 = arith.constant 1.000000e+00 : f32
    %201 = vector.broadcast %cst_39 : f32 to vector<2x16xf32>
    %202 = arith.subf %201, %195 : vector<2x16xf32>
    %203 = arith.mulf %202, %200 : vector<2x16xf32>
    %204 = vector.extract_strided_slice %163 {offsets = [0, 0], sizes = [2, 16], strides = [1, 1]} : vector<2x32xf32> to vector<2x16xf32>
    %205 = arith.mulf %195, %204 : vector<2x16xf32>
    %206 = arith.addf %203, %205 : vector<2x16xf32>
    %207 = vector.extract_strided_slice %175 {offsets = [0, 48], sizes = [2, 16], strides = [1, 1]} : vector<2x96xf32> to vector<2x16xf32>
    %208 = vector.extract_strided_slice %179 {offsets = [0, 48], sizes = [2, 16], strides = [1, 1]} : vector<2x96xf32> to vector<2x16xf32>
    %209 = arith.addf %207, %208 : vector<2x16xf32>
    %210 = arith.negf %209 : vector<2x16xf32>
    %211 = math.exp %210 : vector<2x16xf32>
    %cst_40 = arith.constant 1.000000e+00 : f32
    %212 = vector.broadcast %cst_40 : f32 to vector<2x16xf32>
    %213 = arith.addf %212, %211 : vector<2x16xf32>
    %214 = arith.divf %212, %213 : vector<2x16xf32>
    %215 = vector.extract_strided_slice %175 {offsets = [0, 64], sizes = [2, 16], strides = [1, 1]} : vector<2x96xf32> to vector<2x16xf32>
    %216 = vector.extract_strided_slice %179 {offsets = [0, 64], sizes = [2, 16], strides = [1, 1]} : vector<2x96xf32> to vector<2x16xf32>
    %217 = arith.addf %215, %216 : vector<2x16xf32>
    %218 = arith.negf %217 : vector<2x16xf32>
    %219 = math.exp %218 : vector<2x16xf32>
    %cst_41 = arith.constant 1.000000e+00 : f32
    %220 = vector.broadcast %cst_41 : f32 to vector<2x16xf32>
    %221 = arith.addf %220, %219 : vector<2x16xf32>
    %222 = arith.divf %220, %221 : vector<2x16xf32>
    %223 = vector.extract_strided_slice %175 {offsets = [0, 80], sizes = [2, 16], strides = [1, 1]} : vector<2x96xf32> to vector<2x16xf32>
    %224 = vector.extract_strided_slice %179 {offsets = [0, 80], sizes = [2, 16], strides = [1, 1]} : vector<2x96xf32> to vector<2x16xf32>
    %225 = arith.mulf %214, %224 : vector<2x16xf32>
    %226 = arith.addf %223, %225 : vector<2x16xf32>
    %227 = math.tanh %226 : vector<2x16xf32>
    %cst_42 = arith.constant 1.000000e+00 : f32
    %228 = vector.broadcast %cst_42 : f32 to vector<2x16xf32>
    %229 = arith.subf %228, %222 : vector<2x16xf32>
    %230 = arith.mulf %229, %227 : vector<2x16xf32>
    %231 = vector.extract_strided_slice %163 {offsets = [0, 16], sizes = [2, 16], strides = [1, 1]} : vector<2x32xf32> to vector<2x16xf32>
    %232 = arith.mulf %222, %231 : vector<2x16xf32>
    %233 = arith.addf %230, %232 : vector<2x16xf32>
    %234 = tpu.concatenate %206, %233 in 1 : vector<2x16xf32>, vector<2x16xf32> -> vector<2x32xf32>
    %235 = vector.extract_strided_slice %22 {offsets = [2, 0, 0], sizes = [1, 2, 32], strides = [1, 1, 1]} : vector<8x2x32xi1> to vector<1x2x32xi1>
    %236 = vector.shape_cast %235 : vector<1x2x32xi1> to vector<2x32xi1>
    %237 = arith.select %236, %234, %163 : vector<2x32xi1>, vector<2x32xf32>
    %cst_43 = arith.constant 0.000000e+00 : f32
    %238 = vector.broadcast %cst_43 : f32 to vector<2x32xf32>
    %239 = arith.select %236, %234, %238 : vector<2x32xi1>, vector<2x32xf32>
    %240 = vector.extract_strided_slice %239 {offsets = [0, 0], sizes = [2, 16], strides = [1, 1]} : vector<2x32xf32> to vector<2x16xf32>
    %c2 = arith.constant 2 : index
    %c0_44 = arith.constant 0 : index
    %c0_45 = arith.constant 0 : index
    %241 = vector.load %arg8[%c2, %c0_44, %c0_45] : memref<8x2x32xf32, #tpu.memory_space<vmem>>, vector<1x2x16xf32>
    %242 = vector.shape_cast %241 : vector<1x2x16xf32> to vector<2x16xf32>
    %243 = vector.shape_cast %240 : vector<2x16xf32> to vector<1x2x16xf32>
    tpu.vector_store %arg8[%c2, %c0_44, %c0_45], %243 {strides = array<i32>} : memref<8x2x32xf32, #tpu.memory_space<vmem>>, vector<1x2x16xf32>,
    %244 = vector.extract_strided_slice %239 {offsets = [0, 16], sizes = [2, 16], strides = [1, 1]} : vector<2x32xf32> to vector<2x16xf32>
    %c5 = arith.constant 5 : index
    %c0_46 = arith.constant 0 : index
    %c16_47 = arith.constant 16 : index
    %245 = vector.load %arg8[%c5, %c0_46, %c16_47] : memref<8x2x32xf32, #tpu.memory_space<vmem>>, vector<1x2x16xf32>
    %246 = vector.shape_cast %245 : vector<1x2x16xf32> to vector<2x16xf32>
    %247 = vector.shape_cast %244 : vector<2x16xf32> to vector<1x2x16xf32>
    tpu.vector_store %arg8[%c5, %c0_46, %c16_47], %247 {strides = array<i32>} : memref<8x2x32xf32, #tpu.memory_space<vmem>>, vector<1x2x16xf32>,
    %248 = vector.extract_strided_slice %11 {offsets = [6, 0], sizes = [2, 96], strides = [1, 1]} : vector<16x96xf32> to vector<2x96xf32>
    %249 = vector.extract_strided_slice %11 {offsets = [8, 0], sizes = [2, 96], strides = [1, 1]} : vector<16x96xf32> to vector<2x96xf32>
    %250 = arith.truncf %237 : vector<2x32xf32> to vector<2x32xbf16>
    %cst_48 = arith.constant dense<0.000000e+00> : vector<2x96xf32>
    %251 = tpu.matmul %250, %23, %cst_48 {dimension_numbers = #tpu.dot_dimension_numbers<[1], [0], [0], [1], [0, 0, 1, 1], [], []>} : vector<2x32xbf16>, vector<32x96xbf16>, vector<2x96xf32> -> vector<2x96xf32>
    %252 = vector.broadcast %24 : vector<1x96xf32> to vector<2x96xf32>
    %253 = arith.addf %251, %252 : vector<2x96xf32>
    %254 = vector.extract_strided_slice %248 {offsets = [0, 0], sizes = [2, 16], strides = [1, 1]} : vector<2x96xf32> to vector<2x16xf32>
    %255 = vector.extract_strided_slice %253 {offsets = [0, 0], sizes = [2, 16], strides = [1, 1]} : vector<2x96xf32> to vector<2x16xf32>
    %256 = arith.addf %254, %255 : vector<2x16xf32>
    %257 = arith.negf %256 : vector<2x16xf32>
    %258 = math.exp %257 : vector<2x16xf32>
    %cst_49 = arith.constant 1.000000e+00 : f32
    %259 = vector.broadcast %cst_49 : f32 to vector<2x16xf32>
    %260 = arith.addf %259, %258 : vector<2x16xf32>
    %261 = arith.divf %259, %260 : vector<2x16xf32>
    %262 = vector.extract_strided_slice %248 {offsets = [0, 16], sizes = [2, 16], strides = [1, 1]} : vector<2x96xf32> to vector<2x16xf32>
    %263 = vector.extract_strided_slice %253 {offsets = [0, 16], sizes = [2, 16], strides = [1, 1]} : vector<2x96xf32> to vector<2x16xf32>
    %264 = arith.addf %262, %263 : vector<2x16xf32>
    %265 = arith.negf %264 : vector<2x16xf32>
    %266 = math.exp %265 : vector<2x16xf32>
    %cst_50 = arith.constant 1.000000e+00 : f32
    %267 = vector.broadcast %cst_50 : f32 to vector<2x16xf32>
    %268 = arith.addf %267, %266 : vector<2x16xf32>
    %269 = arith.divf %267, %268 : vector<2x16xf32>
    %270 = vector.extract_strided_slice %248 {offsets = [0, 32], sizes = [2, 16], strides = [1, 1]} : vector<2x96xf32> to vector<2x16xf32>
    %271 = vector.extract_strided_slice %253 {offsets = [0, 32], sizes = [2, 16], strides = [1, 1]} : vector<2x96xf32> to vector<2x16xf32>
    %272 = arith.mulf %261, %271 : vector<2x16xf32>
    %273 = arith.addf %270, %272 : vector<2x16xf32>
    %274 = math.tanh %273 : vector<2x16xf32>
    %cst_51 = arith.constant 1.000000e+00 : f32
    %275 = vector.broadcast %cst_51 : f32 to vector<2x16xf32>
    %276 = arith.subf %275, %269 : vector<2x16xf32>
    %277 = arith.mulf %276, %274 : vector<2x16xf32>
    %278 = vector.extract_strided_slice %237 {offsets = [0, 0], sizes = [2, 16], strides = [1, 1]} : vector<2x32xf32> to vector<2x16xf32>
    %279 = arith.mulf %269, %278 : vector<2x16xf32>
    %280 = arith.addf %277, %279 : vector<2x16xf32>
    %281 = vector.extract_strided_slice %249 {offsets = [0, 48], sizes = [2, 16], strides = [1, 1]} : vector<2x96xf32> to vector<2x16xf32>
    %282 = vector.extract_strided_slice %253 {offsets = [0, 48], sizes = [2, 16], strides = [1, 1]} : vector<2x96xf32> to vector<2x16xf32>
    %283 = arith.addf %281, %282 : vector<2x16xf32>
    %284 = arith.negf %283 : vector<2x16xf32>
    %285 = math.exp %284 : vector<2x16xf32>
    %cst_52 = arith.constant 1.000000e+00 : f32
    %286 = vector.broadcast %cst_52 : f32 to vector<2x16xf32>
    %287 = arith.addf %286, %285 : vector<2x16xf32>
    %288 = arith.divf %286, %287 : vector<2x16xf32>
    %289 = vector.extract_strided_slice %249 {offsets = [0, 64], sizes = [2, 16], strides = [1, 1]} : vector<2x96xf32> to vector<2x16xf32>
    %290 = vector.extract_strided_slice %253 {offsets = [0, 64], sizes = [2, 16], strides = [1, 1]} : vector<2x96xf32> to vector<2x16xf32>
    %291 = arith.addf %289, %290 : vector<2x16xf32>
    %292 = arith.negf %291 : vector<2x16xf32>
    %293 = math.exp %292 : vector<2x16xf32>
    %cst_53 = arith.constant 1.000000e+00 : f32
    %294 = vector.broadcast %cst_53 : f32 to vector<2x16xf32>
    %295 = arith.addf %294, %293 : vector<2x16xf32>
    %296 = arith.divf %294, %295 : vector<2x16xf32>
    %297 = vector.extract_strided_slice %249 {offsets = [0, 80], sizes = [2, 16], strides = [1, 1]} : vector<2x96xf32> to vector<2x16xf32>
    %298 = vector.extract_strided_slice %253 {offsets = [0, 80], sizes = [2, 16], strides = [1, 1]} : vector<2x96xf32> to vector<2x16xf32>
    %299 = arith.mulf %288, %298 : vector<2x16xf32>
    %300 = arith.addf %297, %299 : vector<2x16xf32>
    %301 = math.tanh %300 : vector<2x16xf32>
    %cst_54 = arith.constant 1.000000e+00 : f32
    %302 = vector.broadcast %cst_54 : f32 to vector<2x16xf32>
    %303 = arith.subf %302, %296 : vector<2x16xf32>
    %304 = arith.mulf %303, %301 : vector<2x16xf32>
    %305 = vector.extract_strided_slice %237 {offsets = [0, 16], sizes = [2, 16], strides = [1, 1]} : vector<2x32xf32> to vector<2x16xf32>
    %306 = arith.mulf %296, %305 : vector<2x16xf32>
    %307 = arith.addf %304, %306 : vector<2x16xf32>
    %308 = tpu.concatenate %280, %307 in 1 : vector<2x16xf32>, vector<2x16xf32> -> vector<2x32xf32>
    %309 = vector.extract_strided_slice %22 {offsets = [3, 0, 0], sizes = [1, 2, 32], strides = [1, 1, 1]} : vector<8x2x32xi1> to vector<1x2x32xi1>
    %310 = vector.shape_cast %309 : vector<1x2x32xi1> to vector<2x32xi1>
    %311 = arith.select %310, %308, %237 : vector<2x32xi1>, vector<2x32xf32>
    %cst_55 = arith.constant 0.000000e+00 : f32
    %312 = vector.broadcast %cst_55 : f32 to vector<2x32xf32>
    %313 = arith.select %310, %308, %312 : vector<2x32xi1>, vector<2x32xf32>
    %314 = vector.extract_strided_slice %313 {offsets = [0, 0], sizes = [2, 16], strides = [1, 1]} : vector<2x32xf32> to vector<2x16xf32>
    %c3 = arith.constant 3 : index
    %c0_56 = arith.constant 0 : index
    %c0_57 = arith.constant 0 : index
    %315 = vector.load %arg8[%c3, %c0_56, %c0_57] : memref<8x2x32xf32, #tpu.memory_space<vmem>>, vector<1x2x16xf32>
    %316 = vector.shape_cast %315 : vector<1x2x16xf32> to vector<2x16xf32>
    %317 = vector.shape_cast %314 : vector<2x16xf32> to vector<1x2x16xf32>
    tpu.vector_store %arg8[%c3, %c0_56, %c0_57], %317 {strides = array<i32>} : memref<8x2x32xf32, #tpu.memory_space<vmem>>, vector<1x2x16xf32>,
    %318 = vector.extract_strided_slice %313 {offsets = [0, 16], sizes = [2, 16], strides = [1, 1]} : vector<2x32xf32> to vector<2x16xf32>
    %c4 = arith.constant 4 : index
    %c0_58 = arith.constant 0 : index
    %c16_59 = arith.constant 16 : index
    %319 = vector.load %arg8[%c4, %c0_58, %c16_59] : memref<8x2x32xf32, #tpu.memory_space<vmem>>, vector<1x2x16xf32>
    %320 = vector.shape_cast %319 : vector<1x2x16xf32> to vector<2x16xf32>
    %321 = vector.shape_cast %318 : vector<2x16xf32> to vector<1x2x16xf32>
    tpu.vector_store %arg8[%c4, %c0_58, %c16_59], %321 {strides = array<i32>} : memref<8x2x32xf32, #tpu.memory_space<vmem>>, vector<1x2x16xf32>,
    %322 = vector.extract_strided_slice %11 {offsets = [8, 0], sizes = [2, 96], strides = [1, 1]} : vector<16x96xf32> to vector<2x96xf32>
    %323 = vector.extract_strided_slice %11 {offsets = [6, 0], sizes = [2, 96], strides = [1, 1]} : vector<16x96xf32> to vector<2x96xf32>
    %324 = arith.truncf %311 : vector<2x32xf32> to vector<2x32xbf16>
    %cst_60 = arith.constant dense<0.000000e+00> : vector<2x96xf32>
    %325 = tpu.matmul %324, %23, %cst_60 {dimension_numbers = #tpu.dot_dimension_numbers<[1], [0], [0], [1], [0, 0, 1, 1], [], []>} : vector<2x32xbf16>, vector<32x96xbf16>, vector<2x96xf32> -> vector<2x96xf32>
    %326 = vector.broadcast %24 : vector<1x96xf32> to vector<2x96xf32>
    %327 = arith.addf %325, %326 : vector<2x96xf32>
    %328 = vector.extract_strided_slice %322 {offsets = [0, 0], sizes = [2, 16], strides = [1, 1]} : vector<2x96xf32> to vector<2x16xf32>
    %329 = vector.extract_strided_slice %327 {offsets = [0, 0], sizes = [2, 16], strides = [1, 1]} : vector<2x96xf32> to vector<2x16xf32>
    %330 = arith.addf %328, %329 : vector<2x16xf32>
    %331 = arith.negf %330 : vector<2x16xf32>
    %332 = math.exp %331 : vector<2x16xf32>
    %cst_61 = arith.constant 1.000000e+00 : f32
    %333 = vector.broadcast %cst_61 : f32 to vector<2x16xf32>
    %334 = arith.addf %333, %332 : vector<2x16xf32>
    %335 = arith.divf %333, %334 : vector<2x16xf32>
    %336 = vector.extract_strided_slice %322 {offsets = [0, 16], sizes = [2, 16], strides = [1, 1]} : vector<2x96xf32> to vector<2x16xf32>
    %337 = vector.extract_strided_slice %327 {offsets = [0, 16], sizes = [2, 16], strides = [1, 1]} : vector<2x96xf32> to vector<2x16xf32>
    %338 = arith.addf %336, %337 : vector<2x16xf32>
    %339 = arith.negf %338 : vector<2x16xf32>
    %340 = math.exp %339 : vector<2x16xf32>
    %cst_62 = arith.constant 1.000000e+00 : f32
    %341 = vector.broadcast %cst_62 : f32 to vector<2x16xf32>
    %342 = arith.addf %341, %340 : vector<2x16xf32>
    %343 = arith.divf %341, %342 : vector<2x16xf32>
    %344 = vector.extract_strided_slice %322 {offsets = [0, 32], sizes = [2, 16], strides = [1, 1]} : vector<2x96xf32> to vector<2x16xf32>
    %345 = vector.extract_strided_slice %327 {offsets = [0, 32], sizes = [2, 16], strides = [1, 1]} : vector<2x96xf32> to vector<2x16xf32>
    %346 = arith.mulf %335, %345 : vector<2x16xf32>
    %347 = arith.addf %344, %346 : vector<2x16xf32>
    %348 = math.tanh %347 : vector<2x16xf32>
    %cst_63 = arith.constant 1.000000e+00 : f32
    %349 = vector.broadcast %cst_63 : f32 to vector<2x16xf32>
    %350 = arith.subf %349, %343 : vector<2x16xf32>
    %351 = arith.mulf %350, %348 : vector<2x16xf32>
    %352 = vector.extract_strided_slice %311 {offsets = [0, 0], sizes = [2, 16], strides = [1, 1]} : vector<2x32xf32> to vector<2x16xf32>
    %353 = arith.mulf %343, %352 : vector<2x16xf32>
    %354 = arith.addf %351, %353 : vector<2x16xf32>
    %355 = vector.extract_strided_slice %323 {offsets = [0, 48], sizes = [2, 16], strides = [1, 1]} : vector<2x96xf32> to vector<2x16xf32>
    %356 = vector.extract_strided_slice %327 {offsets = [0, 48], sizes = [2, 16], strides = [1, 1]} : vector<2x96xf32> to vector<2x16xf32>
    %357 = arith.addf %355, %356 : vector<2x16xf32>
    %358 = arith.negf %357 : vector<2x16xf32>
    %359 = math.exp %358 : vector<2x16xf32>
    %cst_64 = arith.constant 1.000000e+00 : f32
    %360 = vector.broadcast %cst_64 : f32 to vector<2x16xf32>
    %361 = arith.addf %360, %359 : vector<2x16xf32>
    %362 = arith.divf %360, %361 : vector<2x16xf32>
    %363 = vector.extract_strided_slice %323 {offsets = [0, 64], sizes = [2, 16], strides = [1, 1]} : vector<2x96xf32> to vector<2x16xf32>
    %364 = vector.extract_strided_slice %327 {offsets = [0, 64], sizes = [2, 16], strides = [1, 1]} : vector<2x96xf32> to vector<2x16xf32>
    %365 = arith.addf %363, %364 : vector<2x16xf32>
    %366 = arith.negf %365 : vector<2x16xf32>
    %367 = math.exp %366 : vector<2x16xf32>
    %cst_65 = arith.constant 1.000000e+00 : f32
    %368 = vector.broadcast %cst_65 : f32 to vector<2x16xf32>
    %369 = arith.addf %368, %367 : vector<2x16xf32>
    %370 = arith.divf %368, %369 : vector<2x16xf32>
    %371 = vector.extract_strided_slice %323 {offsets = [0, 80], sizes = [2, 16], strides = [1, 1]} : vector<2x96xf32> to vector<2x16xf32>
    %372 = vector.extract_strided_slice %327 {offsets = [0, 80], sizes = [2, 16], strides = [1, 1]} : vector<2x96xf32> to vector<2x16xf32>
    %373 = arith.mulf %362, %372 : vector<2x16xf32>
    %374 = arith.addf %371, %373 : vector<2x16xf32>
    %375 = math.tanh %374 : vector<2x16xf32>
    %cst_66 = arith.constant 1.000000e+00 : f32
    %376 = vector.broadcast %cst_66 : f32 to vector<2x16xf32>
    %377 = arith.subf %376, %370 : vector<2x16xf32>
    %378 = arith.mulf %377, %375 : vector<2x16xf32>
    %379 = vector.extract_strided_slice %311 {offsets = [0, 16], sizes = [2, 16], strides = [1, 1]} : vector<2x32xf32> to vector<2x16xf32>
    %380 = arith.mulf %370, %379 : vector<2x16xf32>
    %381 = arith.addf %378, %380 : vector<2x16xf32>
    %382 = tpu.concatenate %354, %381 in 1 : vector<2x16xf32>, vector<2x16xf32> -> vector<2x32xf32>
    %383 = vector.extract_strided_slice %22 {offsets = [4, 0, 0], sizes = [1, 2, 32], strides = [1, 1, 1]} : vector<8x2x32xi1> to vector<1x2x32xi1>
    %384 = vector.shape_cast %383 : vector<1x2x32xi1> to vector<2x32xi1>
    %385 = arith.select %384, %382, %311 : vector<2x32xi1>, vector<2x32xf32>
    %cst_67 = arith.constant 0.000000e+00 : f32
    %386 = vector.broadcast %cst_67 : f32 to vector<2x32xf32>
    %387 = arith.select %384, %382, %386 : vector<2x32xi1>, vector<2x32xf32>
    %388 = vector.extract_strided_slice %387 {offsets = [0, 0], sizes = [2, 16], strides = [1, 1]} : vector<2x32xf32> to vector<2x16xf32>
    %c4_68 = arith.constant 4 : index
    %c0_69 = arith.constant 0 : index
    %c0_70 = arith.constant 0 : index
    %389 = vector.load %arg8[%c4_68, %c0_69, %c0_70] : memref<8x2x32xf32, #tpu.memory_space<vmem>>, vector<1x2x16xf32>
    %390 = vector.shape_cast %389 : vector<1x2x16xf32> to vector<2x16xf32>
    %391 = vector.shape_cast %388 : vector<2x16xf32> to vector<1x2x16xf32>
    tpu.vector_store %arg8[%c4_68, %c0_69, %c0_70], %391 {strides = array<i32>} : memref<8x2x32xf32, #tpu.memory_space<vmem>>, vector<1x2x16xf32>,
    %392 = vector.extract_strided_slice %387 {offsets = [0, 16], sizes = [2, 16], strides = [1, 1]} : vector<2x32xf32> to vector<2x16xf32>
    %c3_71 = arith.constant 3 : index
    %c0_72 = arith.constant 0 : index
    %c16_73 = arith.constant 16 : index
    %393 = vector.load %arg8[%c3_71, %c0_72, %c16_73] : memref<8x2x32xf32, #tpu.memory_space<vmem>>, vector<1x2x16xf32>
    %394 = vector.shape_cast %393 : vector<1x2x16xf32> to vector<2x16xf32>
    %395 = vector.shape_cast %392 : vector<2x16xf32> to vector<1x2x16xf32>
    tpu.vector_store %arg8[%c3_71, %c0_72, %c16_73], %395 {strides = array<i32>} : memref<8x2x32xf32, #tpu.memory_space<vmem>>, vector<1x2x16xf32>,
    %396 = vector.extract_strided_slice %11 {offsets = [10, 0], sizes = [2, 96], strides = [1, 1]} : vector<16x96xf32> to vector<2x96xf32>
    %397 = vector.extract_strided_slice %11 {offsets = [4, 0], sizes = [2, 96], strides = [1, 1]} : vector<16x96xf32> to vector<2x96xf32>
    %398 = arith.truncf %385 : vector<2x32xf32> to vector<2x32xbf16>
    %cst_74 = arith.constant dense<0.000000e+00> : vector<2x96xf32>
    %399 = tpu.matmul %398, %23, %cst_74 {dimension_numbers = #tpu.dot_dimension_numbers<[1], [0], [0], [1], [0, 0, 1, 1], [], []>} : vector<2x32xbf16>, vector<32x96xbf16>, vector<2x96xf32> -> vector<2x96xf32>
    %400 = vector.broadcast %24 : vector<1x96xf32> to vector<2x96xf32>
    %401 = arith.addf %399, %400 : vector<2x96xf32>
    %402 = vector.extract_strided_slice %396 {offsets = [0, 0], sizes = [2, 16], strides = [1, 1]} : vector<2x96xf32> to vector<2x16xf32>
    %403 = vector.extract_strided_slice %401 {offsets = [0, 0], sizes = [2, 16], strides = [1, 1]} : vector<2x96xf32> to vector<2x16xf32>
    %404 = arith.addf %402, %403 : vector<2x16xf32>
    %405 = arith.negf %404 : vector<2x16xf32>
    %406 = math.exp %405 : vector<2x16xf32>
    %cst_75 = arith.constant 1.000000e+00 : f32
    %407 = vector.broadcast %cst_75 : f32 to vector<2x16xf32>
    %408 = arith.addf %407, %406 : vector<2x16xf32>
    %409 = arith.divf %407, %408 : vector<2x16xf32>
    %410 = vector.extract_strided_slice %396 {offsets = [0, 16], sizes = [2, 16], strides = [1, 1]} : vector<2x96xf32> to vector<2x16xf32>
    %411 = vector.extract_strided_slice %401 {offsets = [0, 16], sizes = [2, 16], strides = [1, 1]} : vector<2x96xf32> to vector<2x16xf32>
    %412 = arith.addf %410, %411 : vector<2x16xf32>
    %413 = arith.negf %412 : vector<2x16xf32>
    %414 = math.exp %413 : vector<2x16xf32>
    %cst_76 = arith.constant 1.000000e+00 : f32
    %415 = vector.broadcast %cst_76 : f32 to vector<2x16xf32>
    %416 = arith.addf %415, %414 : vector<2x16xf32>
    %417 = arith.divf %415, %416 : vector<2x16xf32>
    %418 = vector.extract_strided_slice %396 {offsets = [0, 32], sizes = [2, 16], strides = [1, 1]} : vector<2x96xf32> to vector<2x16xf32>
    %419 = vector.extract_strided_slice %401 {offsets = [0, 32], sizes = [2, 16], strides = [1, 1]} : vector<2x96xf32> to vector<2x16xf32>
    %420 = arith.mulf %409, %419 : vector<2x16xf32>
    %421 = arith.addf %418, %420 : vector<2x16xf32>
    %422 = math.tanh %421 : vector<2x16xf32>
    %cst_77 = arith.constant 1.000000e+00 : f32
    %423 = vector.broadcast %cst_77 : f32 to vector<2x16xf32>
    %424 = arith.subf %423, %417 : vector<2x16xf32>
    %425 = arith.mulf %424, %422 : vector<2x16xf32>
    %426 = vector.extract_strided_slice %385 {offsets = [0, 0], sizes = [2, 16], strides = [1, 1]} : vector<2x32xf32> to vector<2x16xf32>
    %427 = arith.mulf %417, %426 : vector<2x16xf32>
    %428 = arith.addf %425, %427 : vector<2x16xf32>
    %429 = vector.extract_strided_slice %397 {offsets = [0, 48], sizes = [2, 16], strides = [1, 1]} : vector<2x96xf32> to vector<2x16xf32>
    %430 = vector.extract_strided_slice %401 {offsets = [0, 48], sizes = [2, 16], strides = [1, 1]} : vector<2x96xf32> to vector<2x16xf32>
    %431 = arith.addf %429, %430 : vector<2x16xf32>
    %432 = arith.negf %431 : vector<2x16xf32>
    %433 = math.exp %432 : vector<2x16xf32>
    %cst_78 = arith.constant 1.000000e+00 : f32
    %434 = vector.broadcast %cst_78 : f32 to vector<2x16xf32>
    %435 = arith.addf %434, %433 : vector<2x16xf32>
    %436 = arith.divf %434, %435 : vector<2x16xf32>
    %437 = vector.extract_strided_slice %397 {offsets = [0, 64], sizes = [2, 16], strides = [1, 1]} : vector<2x96xf32> to vector<2x16xf32>
    %438 = vector.extract_strided_slice %401 {offsets = [0, 64], sizes = [2, 16], strides = [1, 1]} : vector<2x96xf32> to vector<2x16xf32>
    %439 = arith.addf %437, %438 : vector<2x16xf32>
    %440 = arith.negf %439 : vector<2x16xf32>
    %441 = math.exp %440 : vector<2x16xf32>
    %cst_79 = arith.constant 1.000000e+00 : f32
    %442 = vector.broadcast %cst_79 : f32 to vector<2x16xf32>
    %443 = arith.addf %442, %441 : vector<2x16xf32>
    %444 = arith.divf %442, %443 : vector<2x16xf32>
    %445 = vector.extract_strided_slice %397 {offsets = [0, 80], sizes = [2, 16], strides = [1, 1]} : vector<2x96xf32> to vector<2x16xf32>
    %446 = vector.extract_strided_slice %401 {offsets = [0, 80], sizes = [2, 16], strides = [1, 1]} : vector<2x96xf32> to vector<2x16xf32>
    %447 = arith.mulf %436, %446 : vector<2x16xf32>
    %448 = arith.addf %445, %447 : vector<2x16xf32>
    %449 = math.tanh %448 : vector<2x16xf32>
    %cst_80 = arith.constant 1.000000e+00 : f32
    %450 = vector.broadcast %cst_80 : f32 to vector<2x16xf32>
    %451 = arith.subf %450, %444 : vector<2x16xf32>
    %452 = arith.mulf %451, %449 : vector<2x16xf32>
    %453 = vector.extract_strided_slice %385 {offsets = [0, 16], sizes = [2, 16], strides = [1, 1]} : vector<2x32xf32> to vector<2x16xf32>
    %454 = arith.mulf %444, %453 : vector<2x16xf32>
    %455 = arith.addf %452, %454 : vector<2x16xf32>
    %456 = tpu.concatenate %428, %455 in 1 : vector<2x16xf32>, vector<2x16xf32> -> vector<2x32xf32>
    %457 = vector.extract_strided_slice %22 {offsets = [5, 0, 0], sizes = [1, 2, 32], strides = [1, 1, 1]} : vector<8x2x32xi1> to vector<1x2x32xi1>
    %458 = vector.shape_cast %457 : vector<1x2x32xi1> to vector<2x32xi1>
    %459 = arith.select %458, %456, %385 : vector<2x32xi1>, vector<2x32xf32>
    %cst_81 = arith.constant 0.000000e+00 : f32
    %460 = vector.broadcast %cst_81 : f32 to vector<2x32xf32>
    %461 = arith.select %458, %456, %460 : vector<2x32xi1>, vector<2x32xf32>
    %462 = vector.extract_strided_slice %461 {offsets = [0, 0], sizes = [2, 16], strides = [1, 1]} : vector<2x32xf32> to vector<2x16xf32>
    %c5_82 = arith.constant 5 : index
    %c0_83 = arith.constant 0 : index
    %c0_84 = arith.constant 0 : index
    %463 = vector.load %arg8[%c5_82, %c0_83, %c0_84] : memref<8x2x32xf32, #tpu.memory_space<vmem>>, vector<1x2x16xf32>
    %464 = vector.shape_cast %463 : vector<1x2x16xf32> to vector<2x16xf32>
    %465 = vector.shape_cast %462 : vector<2x16xf32> to vector<1x2x16xf32>
    tpu.vector_store %arg8[%c5_82, %c0_83, %c0_84], %465 {strides = array<i32>} : memref<8x2x32xf32, #tpu.memory_space<vmem>>, vector<1x2x16xf32>,
    %466 = vector.extract_strided_slice %461 {offsets = [0, 16], sizes = [2, 16], strides = [1, 1]} : vector<2x32xf32> to vector<2x16xf32>
    %c2_85 = arith.constant 2 : index
    %c0_86 = arith.constant 0 : index
    %c16_87 = arith.constant 16 : index
    %467 = vector.load %arg8[%c2_85, %c0_86, %c16_87] : memref<8x2x32xf32, #tpu.memory_space<vmem>>, vector<1x2x16xf32>
    %468 = vector.shape_cast %467 : vector<1x2x16xf32> to vector<2x16xf32>
    %469 = vector.shape_cast %466 : vector<2x16xf32> to vector<1x2x16xf32>
    tpu.vector_store %arg8[%c2_85, %c0_86, %c16_87], %469 {strides = array<i32>} : memref<8x2x32xf32, #tpu.memory_space<vmem>>, vector<1x2x16xf32>,
    %470 = vector.extract_strided_slice %11 {offsets = [12, 0], sizes = [2, 96], strides = [1, 1]} : vector<16x96xf32> to vector<2x96xf32>
    %471 = vector.extract_strided_slice %11 {offsets = [2, 0], sizes = [2, 96], strides = [1, 1]} : vector<16x96xf32> to vector<2x96xf32>
    %472 = arith.truncf %459 : vector<2x32xf32> to vector<2x32xbf16>
    %cst_88 = arith.constant dense<0.000000e+00> : vector<2x96xf32>
    %473 = tpu.matmul %472, %23, %cst_88 {dimension_numbers = #tpu.dot_dimension_numbers<[1], [0], [0], [1], [0, 0, 1, 1], [], []>} : vector<2x32xbf16>, vector<32x96xbf16>, vector<2x96xf32> -> vector<2x96xf32>
    %474 = vector.broadcast %24 : vector<1x96xf32> to vector<2x96xf32>
    %475 = arith.addf %473, %474 : vector<2x96xf32>
    %476 = vector.extract_strided_slice %470 {offsets = [0, 0], sizes = [2, 16], strides = [1, 1]} : vector<2x96xf32> to vector<2x16xf32>
    %477 = vector.extract_strided_slice %475 {offsets = [0, 0], sizes = [2, 16], strides = [1, 1]} : vector<2x96xf32> to vector<2x16xf32>
    %478 = arith.addf %476, %477 : vector<2x16xf32>
    %479 = arith.negf %478 : vector<2x16xf32>
    %480 = math.exp %479 : vector<2x16xf32>
    %cst_89 = arith.constant 1.000000e+00 : f32
    %481 = vector.broadcast %cst_89 : f32 to vector<2x16xf32>
    %482 = arith.addf %481, %480 : vector<2x16xf32>
    %483 = arith.divf %481, %482 : vector<2x16xf32>
    %484 = vector.extract_strided_slice %470 {offsets = [0, 16], sizes = [2, 16], strides = [1, 1]} : vector<2x96xf32> to vector<2x16xf32>
    %485 = vector.extract_strided_slice %475 {offsets = [0, 16], sizes = [2, 16], strides = [1, 1]} : vector<2x96xf32> to vector<2x16xf32>
    %486 = arith.addf %484, %485 : vector<2x16xf32>
    %487 = arith.negf %486 : vector<2x16xf32>
    %488 = math.exp %487 : vector<2x16xf32>
    %cst_90 = arith.constant 1.000000e+00 : f32
    %489 = vector.broadcast %cst_90 : f32 to vector<2x16xf32>
    %490 = arith.addf %489, %488 : vector<2x16xf32>
    %491 = arith.divf %489, %490 : vector<2x16xf32>
    %492 = vector.extract_strided_slice %470 {offsets = [0, 32], sizes = [2, 16], strides = [1, 1]} : vector<2x96xf32> to vector<2x16xf32>
    %493 = vector.extract_strided_slice %475 {offsets = [0, 32], sizes = [2, 16], strides = [1, 1]} : vector<2x96xf32> to vector<2x16xf32>
    %494 = arith.mulf %483, %493 : vector<2x16xf32>
    %495 = arith.addf %492, %494 : vector<2x16xf32>
    %496 = math.tanh %495 : vector<2x16xf32>
    %cst_91 = arith.constant 1.000000e+00 : f32
    %497 = vector.broadcast %cst_91 : f32 to vector<2x16xf32>
    %498 = arith.subf %497, %491 : vector<2x16xf32>
    %499 = arith.mulf %498, %496 : vector<2x16xf32>
    %500 = vector.extract_strided_slice %459 {offsets = [0, 0], sizes = [2, 16], strides = [1, 1]} : vector<2x32xf32> to vector<2x16xf32>
    %501 = arith.mulf %491, %500 : vector<2x16xf32>
    %502 = arith.addf %499, %501 : vector<2x16xf32>
    %503 = vector.extract_strided_slice %471 {offsets = [0, 48], sizes = [2, 16], strides = [1, 1]} : vector<2x96xf32> to vector<2x16xf32>
    %504 = vector.extract_strided_slice %475 {offsets = [0, 48], sizes = [2, 16], strides = [1, 1]} : vector<2x96xf32> to vector<2x16xf32>
    %505 = arith.addf %503, %504 : vector<2x16xf32>
    %506 = arith.negf %505 : vector<2x16xf32>
    %507 = math.exp %506 : vector<2x16xf32>
    %cst_92 = arith.constant 1.000000e+00 : f32
    %508 = vector.broadcast %cst_92 : f32 to vector<2x16xf32>
    %509 = arith.addf %508, %507 : vector<2x16xf32>
    %510 = arith.divf %508, %509 : vector<2x16xf32>
    %511 = vector.extract_strided_slice %471 {offsets = [0, 64], sizes = [2, 16], strides = [1, 1]} : vector<2x96xf32> to vector<2x16xf32>
    %512 = vector.extract_strided_slice %475 {offsets = [0, 64], sizes = [2, 16], strides = [1, 1]} : vector<2x96xf32> to vector<2x16xf32>
    %513 = arith.addf %511, %512 : vector<2x16xf32>
    %514 = arith.negf %513 : vector<2x16xf32>
    %515 = math.exp %514 : vector<2x16xf32>
    %cst_93 = arith.constant 1.000000e+00 : f32
    %516 = vector.broadcast %cst_93 : f32 to vector<2x16xf32>
    %517 = arith.addf %516, %515 : vector<2x16xf32>
    %518 = arith.divf %516, %517 : vector<2x16xf32>
    %519 = vector.extract_strided_slice %471 {offsets = [0, 80], sizes = [2, 16], strides = [1, 1]} : vector<2x96xf32> to vector<2x16xf32>
    %520 = vector.extract_strided_slice %475 {offsets = [0, 80], sizes = [2, 16], strides = [1, 1]} : vector<2x96xf32> to vector<2x16xf32>
    %521 = arith.mulf %510, %520 : vector<2x16xf32>
    %522 = arith.addf %519, %521 : vector<2x16xf32>
    %523 = math.tanh %522 : vector<2x16xf32>
    %cst_94 = arith.constant 1.000000e+00 : f32
    %524 = vector.broadcast %cst_94 : f32 to vector<2x16xf32>
    %525 = arith.subf %524, %518 : vector<2x16xf32>
    %526 = arith.mulf %525, %523 : vector<2x16xf32>
    %527 = vector.extract_strided_slice %459 {offsets = [0, 16], sizes = [2, 16], strides = [1, 1]} : vector<2x32xf32> to vector<2x16xf32>
    %528 = arith.mulf %518, %527 : vector<2x16xf32>
    %529 = arith.addf %526, %528 : vector<2x16xf32>
    %530 = tpu.concatenate %502, %529 in 1 : vector<2x16xf32>, vector<2x16xf32> -> vector<2x32xf32>
    %531 = vector.extract_strided_slice %22 {offsets = [6, 0, 0], sizes = [1, 2, 32], strides = [1, 1, 1]} : vector<8x2x32xi1> to vector<1x2x32xi1>
    %532 = vector.shape_cast %531 : vector<1x2x32xi1> to vector<2x32xi1>
    %533 = arith.select %532, %530, %459 : vector<2x32xi1>, vector<2x32xf32>
    %cst_95 = arith.constant 0.000000e+00 : f32
    %534 = vector.broadcast %cst_95 : f32 to vector<2x32xf32>
    %535 = arith.select %532, %530, %534 : vector<2x32xi1>, vector<2x32xf32>
    %536 = vector.extract_strided_slice %535 {offsets = [0, 0], sizes = [2, 16], strides = [1, 1]} : vector<2x32xf32> to vector<2x16xf32>
    %c6_96 = arith.constant 6 : index
    %c0_97 = arith.constant 0 : index
    %c0_98 = arith.constant 0 : index
    %537 = vector.load %arg8[%c6_96, %c0_97, %c0_98] : memref<8x2x32xf32, #tpu.memory_space<vmem>>, vector<1x2x16xf32>
    %538 = vector.shape_cast %537 : vector<1x2x16xf32> to vector<2x16xf32>
    %539 = vector.shape_cast %536 : vector<2x16xf32> to vector<1x2x16xf32>
    tpu.vector_store %arg8[%c6_96, %c0_97, %c0_98], %539 {strides = array<i32>} : memref<8x2x32xf32, #tpu.memory_space<vmem>>, vector<1x2x16xf32>,
    %540 = vector.extract_strided_slice %535 {offsets = [0, 16], sizes = [2, 16], strides = [1, 1]} : vector<2x32xf32> to vector<2x16xf32>
    %c1_99 = arith.constant 1 : index
    %c0_100 = arith.constant 0 : index
    %c16_101 = arith.constant 16 : index
    %541 = vector.load %arg8[%c1_99, %c0_100, %c16_101] : memref<8x2x32xf32, #tpu.memory_space<vmem>>, vector<1x2x16xf32>
    %542 = vector.shape_cast %541 : vector<1x2x16xf32> to vector<2x16xf32>
    %543 = vector.shape_cast %540 : vector<2x16xf32> to vector<1x2x16xf32>
    tpu.vector_store %arg8[%c1_99, %c0_100, %c16_101], %543 {strides = array<i32>} : memref<8x2x32xf32, #tpu.memory_space<vmem>>, vector<1x2x16xf32>,
    %544 = vector.extract_strided_slice %11 {offsets = [14, 0], sizes = [2, 96], strides = [1, 1]} : vector<16x96xf32> to vector<2x96xf32>
    %545 = vector.extract_strided_slice %11 {offsets = [0, 0], sizes = [2, 96], strides = [1, 1]} : vector<16x96xf32> to vector<2x96xf32>
    %546 = arith.truncf %533 : vector<2x32xf32> to vector<2x32xbf16>
    %cst_102 = arith.constant dense<0.000000e+00> : vector<2x96xf32>
    %547 = tpu.matmul %546, %23, %cst_102 {dimension_numbers = #tpu.dot_dimension_numbers<[1], [0], [0], [1], [0, 0, 1, 1], [], []>} : vector<2x32xbf16>, vector<32x96xbf16>, vector<2x96xf32> -> vector<2x96xf32>
    %548 = vector.broadcast %24 : vector<1x96xf32> to vector<2x96xf32>
    %549 = arith.addf %547, %548 : vector<2x96xf32>
    %550 = vector.extract_strided_slice %544 {offsets = [0, 0], sizes = [2, 16], strides = [1, 1]} : vector<2x96xf32> to vector<2x16xf32>
    %551 = vector.extract_strided_slice %549 {offsets = [0, 0], sizes = [2, 16], strides = [1, 1]} : vector<2x96xf32> to vector<2x16xf32>
    %552 = arith.addf %550, %551 : vector<2x16xf32>
    %553 = arith.negf %552 : vector<2x16xf32>
    %554 = math.exp %553 : vector<2x16xf32>
    %cst_103 = arith.constant 1.000000e+00 : f32
    %555 = vector.broadcast %cst_103 : f32 to vector<2x16xf32>
    %556 = arith.addf %555, %554 : vector<2x16xf32>
    %557 = arith.divf %555, %556 : vector<2x16xf32>
    %558 = vector.extract_strided_slice %544 {offsets = [0, 16], sizes = [2, 16], strides = [1, 1]} : vector<2x96xf32> to vector<2x16xf32>
    %559 = vector.extract_strided_slice %549 {offsets = [0, 16], sizes = [2, 16], strides = [1, 1]} : vector<2x96xf32> to vector<2x16xf32>
    %560 = arith.addf %558, %559 : vector<2x16xf32>
    %561 = arith.negf %560 : vector<2x16xf32>
    %562 = math.exp %561 : vector<2x16xf32>
    %cst_104 = arith.constant 1.000000e+00 : f32
    %563 = vector.broadcast %cst_104 : f32 to vector<2x16xf32>
    %564 = arith.addf %563, %562 : vector<2x16xf32>
    %565 = arith.divf %563, %564 : vector<2x16xf32>
    %566 = vector.extract_strided_slice %544 {offsets = [0, 32], sizes = [2, 16], strides = [1, 1]} : vector<2x96xf32> to vector<2x16xf32>
    %567 = vector.extract_strided_slice %549 {offsets = [0, 32], sizes = [2, 16], strides = [1, 1]} : vector<2x96xf32> to vector<2x16xf32>
    %568 = arith.mulf %557, %567 : vector<2x16xf32>
    %569 = arith.addf %566, %568 : vector<2x16xf32>
    %570 = math.tanh %569 : vector<2x16xf32>
    %cst_105 = arith.constant 1.000000e+00 : f32
    %571 = vector.broadcast %cst_105 : f32 to vector<2x16xf32>
    %572 = arith.subf %571, %565 : vector<2x16xf32>
    %573 = arith.mulf %572, %570 : vector<2x16xf32>
    %574 = vector.extract_strided_slice %533 {offsets = [0, 0], sizes = [2, 16], strides = [1, 1]} : vector<2x32xf32> to vector<2x16xf32>
    %575 = arith.mulf %565, %574 : vector<2x16xf32>
    %576 = arith.addf %573, %575 : vector<2x16xf32>
    %577 = vector.extract_strided_slice %545 {offsets = [0, 48], sizes = [2, 16], strides = [1, 1]} : vector<2x96xf32> to vector<2x16xf32>
    %578 = vector.extract_strided_slice %549 {offsets = [0, 48], sizes = [2, 16], strides = [1, 1]} : vector<2x96xf32> to vector<2x16xf32>
    %579 = arith.addf %577, %578 : vector<2x16xf32>
    %580 = arith.negf %579 : vector<2x16xf32>
    %581 = math.exp %580 : vector<2x16xf32>
    %cst_106 = arith.constant 1.000000e+00 : f32
    %582 = vector.broadcast %cst_106 : f32 to vector<2x16xf32>
    %583 = arith.addf %582, %581 : vector<2x16xf32>
    %584 = arith.divf %582, %583 : vector<2x16xf32>
    %585 = vector.extract_strided_slice %545 {offsets = [0, 64], sizes = [2, 16], strides = [1, 1]} : vector<2x96xf32> to vector<2x16xf32>
    %586 = vector.extract_strided_slice %549 {offsets = [0, 64], sizes = [2, 16], strides = [1, 1]} : vector<2x96xf32> to vector<2x16xf32>
    %587 = arith.addf %585, %586 : vector<2x16xf32>
    %588 = arith.negf %587 : vector<2x16xf32>
    %589 = math.exp %588 : vector<2x16xf32>
    %cst_107 = arith.constant 1.000000e+00 : f32
    %590 = vector.broadcast %cst_107 : f32 to vector<2x16xf32>
    %591 = arith.addf %590, %589 : vector<2x16xf32>
    %592 = arith.divf %590, %591 : vector<2x16xf32>
    %593 = vector.extract_strided_slice %545 {offsets = [0, 80], sizes = [2, 16], strides = [1, 1]} : vector<2x96xf32> to vector<2x16xf32>
    %594 = vector.extract_strided_slice %549 {offsets = [0, 80], sizes = [2, 16], strides = [1, 1]} : vector<2x96xf32> to vector<2x16xf32>
    %595 = arith.mulf %584, %594 : vector<2x16xf32>
    %596 = arith.addf %593, %595 : vector<2x16xf32>
    %597 = math.tanh %596 : vector<2x16xf32>
    %cst_108 = arith.constant 1.000000e+00 : f32
    %598 = vector.broadcast %cst_108 : f32 to vector<2x16xf32>
    %599 = arith.subf %598, %592 : vector<2x16xf32>
    %600 = arith.mulf %599, %597 : vector<2x16xf32>
    %601 = vector.extract_strided_slice %533 {offsets = [0, 16], sizes = [2, 16], strides = [1, 1]} : vector<2x32xf32> to vector<2x16xf32>
    %602 = arith.mulf %592, %601 : vector<2x16xf32>
    %603 = arith.addf %600, %602 : vector<2x16xf32>
    %604 = tpu.concatenate %576, %603 in 1 : vector<2x16xf32>, vector<2x16xf32> -> vector<2x32xf32>
    %605 = vector.extract_strided_slice %22 {offsets = [7, 0, 0], sizes = [1, 2, 32], strides = [1, 1, 1]} : vector<8x2x32xi1> to vector<1x2x32xi1>
    %606 = vector.shape_cast %605 : vector<1x2x32xi1> to vector<2x32xi1>
    %607 = arith.select %606, %604, %533 : vector<2x32xi1>, vector<2x32xf32>
    %cst_109 = arith.constant 0.000000e+00 : f32
    %608 = vector.broadcast %cst_109 : f32 to vector<2x32xf32>
    %609 = arith.select %606, %604, %608 : vector<2x32xi1>, vector<2x32xf32>
    %610 = vector.extract_strided_slice %609 {offsets = [0, 0], sizes = [2, 16], strides = [1, 1]} : vector<2x32xf32> to vector<2x16xf32>
    %c7_110 = arith.constant 7 : index
    %c0_111 = arith.constant 0 : index
    %c0_112 = arith.constant 0 : index
    %611 = vector.load %arg8[%c7_110, %c0_111, %c0_112] : memref<8x2x32xf32, #tpu.memory_space<vmem>>, vector<1x2x16xf32>
    %612 = vector.shape_cast %611 : vector<1x2x16xf32> to vector<2x16xf32>
    %613 = vector.shape_cast %610 : vector<2x16xf32> to vector<1x2x16xf32>
    tpu.vector_store %arg8[%c7_110, %c0_111, %c0_112], %613 {strides = array<i32>} : memref<8x2x32xf32, #tpu.memory_space<vmem>>, vector<1x2x16xf32>,
    %614 = vector.extract_strided_slice %609 {offsets = [0, 16], sizes = [2, 16], strides = [1, 1]} : vector<2x32xf32> to vector<2x16xf32>
    %c0_113 = arith.constant 0 : index
    %c0_114 = arith.constant 0 : index
    %c16_115 = arith.constant 16 : index
    %615 = vector.load %arg8[%c0_113, %c0_114, %c16_115] : memref<8x2x32xf32, #tpu.memory_space<vmem>>, vector<1x2x16xf32>
    %616 = vector.shape_cast %615 : vector<1x2x16xf32> to vector<2x16xf32>
    %617 = vector.shape_cast %614 : vector<2x16xf32> to vector<1x2x16xf32>
    tpu.vector_store %arg8[%c0_113, %c0_114, %c16_115], %617 {strides = array<i32>} : memref<8x2x32xf32, #tpu.memory_space<vmem>>, vector<1x2x16xf32>,
    %618 = arith.truncf %607 : vector<2x32xf32> to vector<2x32xbf16>
    %c0_116 = arith.constant 0 : index
    %c0_117 = arith.constant 0 : index
    %619 = vector.load %arg6[%c0_116, %c0_117] : memref<32x32xbf16, #tpu.memory_space<vmem>>, vector<32x32xbf16>
    %cst_118 = arith.constant dense<0.000000e+00> : vector<2x32xf32>
    %620 = tpu.matmul %618, %619, %cst_118 {dimension_numbers = #tpu.dot_dimension_numbers<[1], [0], [0], [1], [0, 0, 1, 1], [], []>} : vector<2x32xbf16>, vector<32x32xbf16>, vector<2x32xf32> -> vector<2x32xf32>
    %c0_119 = arith.constant 0 : index
    %c0_120 = arith.constant 0 : index
    %621 = vector.load %arg7[%c0_119, %c0_120] : memref<1x32xf32, #tpu.memory_space<vmem>>, vector<1x32xf32>
    %622 = vector.broadcast %621 : vector<1x32xf32> to vector<2x32xf32>
    %623 = arith.addf %620, %622 : vector<2x32xf32>
    %624 = math.tanh %623 : vector<2x32xf32>
    %c0_121 = arith.constant 0 : index
    %c0_122 = arith.constant 0 : index
    %625 = vector.load %arg9[%c0_121, %c0_122] : memref<2x32xf32, #tpu.memory_space<vmem>>, vector<2x32xf32>
    tpu.vector_store %arg9[%c0_121, %c0_122], %624 {strides = array<i32>} : memref<2x32xf32, #tpu.memory_space<vmem>>, vector<2x32xf32>,
    return
  }
}

</mosaic_0001>

<bundles_post_ra>
// kernel: encoder_forward.1
= control target key start
LH: loop header
LB: loop body
LE: loop exit
PB: predicated region body
PF: predicated region fallthrough
CT: control target
= control target key end

     0   :  { %15 = vsyncpa [#allocation3], 0  ;;  %s2046_s0 = inlined_call_operand.vmem [shape: s32[16,1], index: 0, kind: input, shape index: {}]   ;;  %s2047_s1 = inlined_call_operand.vmem [shape: s32[2,1], index: 1, kind: input, shape index: {}]   ;;  %s2048_s2 = inlined_call_operand.vmem [shape: bf16[20,96], index: 2, kind: input, shape index: {}]   ;;  %s2049_s3 = inlined_call_operand.vmem [shape: f32[1,96], index: 3, kind: input, shape index: {}]   ;;  %s2050_s4 = inlined_call_operand.vmem [shape: bf16[32,96], index: 4, kind: input, shape index: {}]   ;;  %s2051_s5 = inlined_call_operand.hbm [shape: f32[1,96], index: 5, kind: input, shape index: {}]   ;;  %s2052_s6 = inlined_call_operand.vmem [shape: bf16[32,32], index: 6, kind: input, shape index: {}]   ;;  %s2053_s7 = inlined_call_operand.vmem [shape: f32[1,32], index: 7, kind: input, shape index: {}]   ;;  %s2054_s8 = inlined_call_operand.hbm [shape: f32[8,2,32], index: 8, kind: output, shape index: {0}]   ;;  %s2055_s9 = inlined_call_operand.hbm [shape: f32[2,32], index: 9, kind: output, shape index: {1}]  }
   0x1   :  { %16 = vsyncpa [#allocation4], 0 }
   0x2   :  { %17 = vsyncpa [#allocation7], 0  ;;  %s1603_s30 = smov [#allocation2]   ;;  %s1531_s13 = scalar_lea.hbm %s2051_s5, 16 }
   0x3   :  { %s34_s10 = sshll.u32 %s1603_s30, 4  ;;  %p1532_p0 = scmp.ne.s32.totalorder %s2051_s5, %s1531_s13  ;;  %s35_s10 = int_to_ptr.vmem [resolvable:$true] %s34_s10 }
   0x4   :  { %p1535_p1 = scmp.lt.u32.totalorder %s1531_s13, %s2051_s5 }
   0x6   :  { %p1537_p2 = pnand %p1535_p1, %p1532_p0 }
   0x8   :  { %1540 = shalt.err (!%p1537_p2)
}
   0x9   :  { %s1541_s18 = scalar_lea.vmem %s35_s10, 16  ;;  %s1545_s19 = scalar_lea.vmem %s35_s10, 32 }
   0xa   :  { %p1542_p3 = scmp.ne.s32.totalorder %s35_s10, %s1541_s18  ;;  %p1546_p4 = scmp.lt.s32.totalorder %s35_s10, %s35_s10 }
   0xb   :  { %p1547_p5 = scmp.lt.s32.totalorder %s1545_s19, %s1541_s18 }
   0xd   :  { %p1548_p6 = por %p1547_p5, %p1546_p4 }
   0xf   :  { %p1549_p7 = pnand %p1548_p6, %p1542_p3 }
  0x11   :  { %1552 = shalt.err (!%p1549_p7)
}
  0x12   :  { %37 = dma.hbm_to_vmem [thread:$0]  %s2051_s5, 16, %s35_s10, [#allocation3]  }
  0x13   :  { %1597 = dma.done.wait [#allocation3], 16  }
  0x14   :  { %1598 = vsyncadd [#allocation3], 4294967280  ;;  %v1604_v0 = vmov 0   ;;  %v1605_v1 = vmov 0.0   ;;  %vm1606_vm0 = vmmov 0   ;;  %v46_v2 = vld [vmem:[%s2046_s0] sm:$0xff]  ;;  %v48_v9 = vlaneseq }
  0x15   :  { %1425 = vset.pattern.permute.xlu0 %v1604_v0  ;;  %1333 = vmatprep.subr.bf16.mxu1 %v1605_v1  ;;  %v47_v3 = vld [vmem:[%s2046_s0 + $0x8] sm:$0xff]  ;;  %v1701_v4 = vld [vmem:[%s2050_s4] sm:$0xff]   ;;  %vm86_vm1 = vcmask 1041408   ;;  %vm82_vm4 = vcmask 162816   ;;  %s1609_s12 = smov 112   ;;  %s1610_s15 = smov 80  }
  0x16   :  { %1337 = vmatprep.mubr.msk.bf16.mxu1 %vm1606_vm0, %v1605_v1  ;;  %1325 = vmatprep.subr.bf16.mxu0 %v1605_v1  ;;  %v1706_v5 = vld [vmem:[%s2050_s4 + $0x8] sm:$0xff]   ;;  %v1428_v6 = vld [vmem:[%s2048_s2] sm:$0xff]   ;;  %v1727_v10 = vand.u32 127, %v48_v9  ;;  %v1611_v63 = vmov 7   ;;  %vm281_vm6 = vcmask 130048   ;;  %vm284_vm7 = vcmask 123904  }
  0x17   :  { %1329 = vmatprep.mubr.msk.bf16.mxu0 %vm1606_vm0, %v1605_v1  ;;  %51 = vperm.xlu0 %1425, %v46_v2   ;;  %v1429_v7 = vld [vmem:[%s2048_s2 + $0x8] ss:$0 sps:$4 sm:$0x33]   ;;  %v1739_v16 = vld [vmem:[#allocation2] ss:$0 sm:$0xff]  ;;  %s1607_s2 = smov 96  }
  0x18   :  { %1334 = vmatpush3.bf16.msra.mxu1 %v1701_v4  ;;  %1326 = vmatpush3.bf16.msra.mxu0 %v1428_v6  ;;  %v88_v8 = vsel %vm86_vm1, %v1429_v7, 0  ;;  %v1261_v23 = vld [vmem:[%s2049_s3] ss:$0 sm:$0xff]  ;;  %s1608_s3 = smov 32   ;;  %vm132_vm5 = vcmp.lt.s32.totalorder %v1727_v10, 16  ;;  %vm287_vm8 = vcmask 255104  }
  0x19   :  { %1335 = vmatprep.subr.bf16.mxu1 %v1605_v1  ;;  %1327 = vmatprep.subr.bf16.mxu0 %v1605_v1  ;;  %v131_v50 = vld [vmem:[%s2047_s1] sm:$0x3]  ;;  %v133_v2 = vsel %vm132_vm5, 0, %v1611_v63  ;;  %vm175_vm10 = vcmask 261120   ;;  %s1612_s1 = smov 48   ;;  %s1613_s16 = smov 16  }
  0x1b   :  { %54 = vperm.xlu0 %1425, %v47_v3  }
  0x1c   :  { %1336 = vmatpush3.bf16.msra.mxu1 %v1706_v5  ;;  %1328 = vmatpush3.bf16.msra.mxu0 %v88_v8 }
  0x1d   :  { %1349 = vmatprep.subr.bf16.mxu1 %v1605_v1  ;;  %1341 = vmatprep.subr.bf16.mxu0 %v1605_v1 }
  0x1f   :  { %1338 = vmatmul.mubr.bf16.vlgmr.msra.gmra.mrb[0].mxu1 %v1604_v0 }
  0x20   :  { %1350 = vmatpush3.bf16.msra.mxu1 %v1701_v4  ;;  %1353 = vmatprep.mubr.msk.bf16.mxu1 %vm1606_vm0, %v1605_v1 }
  0x21   :  { %1351 = vmatprep.subr.bf16.mxu1 %v1605_v1 }
  0x24   :  { %1352 = vmatpush3.bf16.msra.mxu1 %v1706_v5 }
  0x25   :  { %1365 = vmatprep.subr.bf16.mxu1 %v1605_v1 }
  0x96   :  { %v52_v11 = vpop.permute.xlu0 %51 }
  0x97   :  { %vm56_vm2 = vcmp.eq.s32.totalorder %v1727_v10, %v52_v11 }
  0x98   :  { %v1259_v13 = vsel %vm56_vm2, 1.0, %v1605_v1 }
  0x9a   :  { %v55_v12 = vpop.permute.xlu0 %54 }
  0x9b   :  { %vm57_vm3 = vcmp.eq.s32.totalorder %v1727_v10, %v55_v12 }
  0x9c   :  { %v1260_v14 = vsel %vm57_vm3, 1.0, %v1605_v1 }
  0x9d   :  { %v62_v15 = vpack.c.bf16 %v1260_v14, %v1259_v13 }
  0x9f   :  { %1330 = vmatmul.mubr.msk.bf16.vlgmr.msra.gmra.mrb[0].mxu0 %vm82_vm4, %v62_v15 }
  0xa0   :  { %1342 = vmatpush3.bf16.msra.mxu0 %v1701_v4  ;;  %1345 = vmatprep.mubr.msk.bf16.mxu0 %vm1606_vm0, %v1605_v1 }
  0xa1   :  { %1343 = vmatprep.subr.bf16.mxu0 %v1605_v1 }
  0xa4   :  { %1344 = vmatpush3.bf16.msra.mxu0 %v1706_v5 }
  0xa5   :  { %1357 = vmatprep.subr.bf16.mxu0 %v1605_v1 }
  0xf2   :  { %v213_v17 = vpop.f32.mrb[0].mxu1 }
  0xf3   :  { %v214_v18 = vadd.f32 %v1739_v16, %v213_v17  ;;  %v1339_v19 = vpop.f32.mrb[1].mxu1 }
  0xf4   :  { %v216_v20 = vpop.f32.mrb[2].mxu1 }
  0xf5   :  { %v245_v21 = vrot.slane %v214_v18, 2  ;;  %v1340_v22 = vpop.f32.mrb[3].mxu1 }
  0xf7   :  { %254 = vrot.lane.b32.xlu1 %v245_v21, %s1607_s2 }
  0xfb   :  { %227 = vrot.lane.b32.xlu1 %v214_v18, %s1607_s2 }
 0x169   :  { %v255_v38 = vpop.permute.xlu1 %254 }
 0x16d   :  { %v228_v40 = vpop.permute.xlu1 %227 }
 0x172   :  { %v124_v24 = vpop.f32.mrb[0].mxu0 }
 0x173   :  { %v1747_v25 = vadd.f32 %v1261_v23, %v124_v24  ;;  %v1331_v26 = vpop.f32.mrb[1].mxu0 }
 0x174   :  { %v127_v27 = vpop.f32.mrb[2].mxu0 }
 0x175   :  { %v1749_v28 = vadd.f32 %v1261_v23, %v127_v27  ;;  %v1332_v29 = vpop.f32.mrb[3].mxu0  ;;  %v219_v30 = vadd.f32 %v214_v18, %v1747_v25 }
 0x177   :  { %v247_v31 = vadd.f32 %v245_v21, %v1749_v28  ;;  %v1268_v32 = vmul.f32 -1.442695, %v219_v30 }
 0x179   :  { %v1269_v33 = vmul.f32 -1.442695, %v247_v31  ;;  %1432 = vpow2.f32 %v1268_v32 }
 0x17b   :  { %1434 = vpow2.f32 %v1269_v33 }
 0x183   :  { %v1433_v34 = vpop.eup %1432 }
 0x184   :  { %v223_v35 = vadd.f32 1.0, %v1433_v34 }
 0x185   :  { %v1435_v36 = vpop.eup %1434 }
 0x186   :  { %v251_v37 = vadd.f32 1.0, %v1435_v36  ;;  %1436 = vrcp.f32 %v223_v35 }
 0x188   :  { %1438 = vrcp.f32 %v251_v37 }
 0x190   :  { %v1437_v39 = vpop.eup %1436 }
 0x191   :  { %v230_v41 = vmul.f32 %v1437_v39, %v228_v40  ;;  %v237_v51 = vsub.f32 1.0, %v1437_v39  ;;  %v243_v53 = vmul.f32 0.0, %v1437_v39 }
 0x192   :  { %v1439_v42 = vpop.eup %1438 }
 0x193   :  { %v257_v43 = vmul.f32 %v1439_v42, %v255_v38  ;;  %232 = vrot.lane.b32.xlu1 %v230_v41, %s1608_s3  ;;  %v264_v55 = vsub.f32 1.0, %v1439_v42  ;;  %v270_v58 = vmul.f32 0.0, %v1439_v42 }
 0x195   :  { %259 = vrot.lane.b32.xlu0 %v257_v43, %s1608_s3 }
 0x205   :  { %v233_v44 = vpop.permute.xlu1 %232 }
 0x206   :  { %v235_v45 = vadd.f32 %v233_v44, %v1747_v25 }
 0x207   :  { %v260_v46 = vpop.permute.xlu0 %259 }
 0x208   :  { %1440 = vtanh.f32 %v235_v45  ;;  %v262_v47 = vadd.f32 %v260_v46, %v1749_v28 }
 0x20a   :  { %1442 = vtanh.f32 %v262_v47 }
 0x212   :  { %v1441_v48 = vpop.eup %1440 }
 0x213   :  { %239 = vrot.lane.b32.xlu1 %v1441_v48, %s1609_s12 }
 0x214   :  { %v1443_v49 = vpop.eup %1442 }
 0x215   :  { %266 = vrot.lane.b32.xlu0 %v1443_v49, %s1609_s12 }
 0x219   :  { %142 = vperm.xlu0 %1425, %v131_v50  }
 0x285   :  { %v240_v52 = vpop.permute.xlu1 %239 }
 0x286   :  { %v242_v54 = vmul.f32 %v240_v52, %v237_v51 }
 0x287   :  { %v267_v56 = vpop.permute.xlu0 %266 }
 0x288   :  { %v244_v57 = vadd.f32 %v243_v53, %v242_v54  ;;  %v269_v59 = vmul.f32 %v267_v56, %v264_v55 }
 0x28a   :  { %v271_v60 = vadd.f32 %v270_v58, %v269_v59  ;;  %273 = vrot.lane.b32.xlu1 %v244_v57, %s1609_s12  ;;  %v1614_v57 = vmov 6  }
 0x28b   :  { %v134_v58 = vsel %vm132_vm5, 1, %v1614_v57 }
 0x28c   :  { %v277_v61 = vrot.slane %v271_v60, 6 }
 0x28e   :  { %278 = vrot.lane.b32.xlu0 %v277_v61, %s1610_s15 }
 0x298   :  { %v1765_v62 = vpop.permute.xlu0 %142 }
 0x299   :  { %vm144_vm9 = vcmp.lt.s32.totalorder %v133_v2, %v1765_v62  ;;  %vm145_vm11 = vcmp.lt.s32.totalorder %v134_v58, %v1765_v62 }
 0x2fc   :  { %v274_v3 = vpop.permute.xlu1 %273 }
 0x300   :  { %v279_v6 = vpop.permute.xlu0 %278 }
 0x301   :  { %v282_v7 = vsel %vm281_vm6, %v274_v3, %v279_v6 }
 0x302   :  { %v1771_v8 = vsel %vm144_vm9, %v282_v7, 0.0 }
 0x303   :  { %285 = vst.msk [vmem:[#allocation5] sm:$0x3] %vm284_vm7, %v1771_v8  ;;  %v289_v9 = vpack.c.bf16 %v1771_v8, %v1771_v8  ;;  %v391_v35 = vrot.slane %v1771_v8, 4  ;;  %v360_v36 = vrot.slane %v1771_v8, 6 }
 0x304   :  { %288 = vst.msk [vmem:[#allocation5 + $0xe] sm:$0x3] %vm287_vm8, %v1771_v8 }
 0x305   :  { %1346 = vmatmul.mubr.msk.bf16.vlgmr.msra.gmra.mrb[4].mxu0 %vm175_vm10, %v289_v9 }
 0x306   :  { %1358 = vmatpush3.bf16.msra.mxu0 %v1701_v4  ;;  %1361 = vmatprep.mubr.msk.bf16.mxu0 %vm1606_vm0, %v1605_v1 }
 0x307   :  { %1359 = vmatprep.subr.bf16.mxu0 %v1605_v1 }
 0x30a   :  { %1360 = vmatpush3.bf16.msra.mxu0 %v1706_v5 }
 0x30b   :  { %1373 = vmatprep.subr.bf16.mxu0 %v1605_v1 }
 0x3d8   :  { %v327_v11 = vpop.f32.mrb[4].mxu0 }
 0x3d9   :  { %v328_v12 = vadd.f32 %v1739_v16, %v327_v11  ;;  %v1347_v13 = vpop.f32.mrb[5].mxu0 }
 0x3da   :  { %v330_v14 = vpop.f32.mrb[6].mxu0 }
 0x3db   :  { %v334_v15 = vrot.slane %v328_v12, 6  ;;  %v366_v17 = vrot.slane %v328_v12, 4  ;;  %v1348_v18 = vpop.f32.mrb[7].mxu0 }
 0x3dd   :  { %375 = vrot.lane.b32.xlu1 %v366_v17, %s1607_s2  ;;  %343 = vrot.lane.b32.xlu0 %v334_v15, %s1607_s2  ;;  %v336_v19 = vadd.f32 %v334_v15, %v1747_v25  ;;  %v368_v20 = vadd.f32 %v366_v17, %v1749_v28 }
 0x3df   :  { %v1271_v21 = vmul.f32 -1.442695, %v336_v19  ;;  %v1272_v22 = vmul.f32 -1.442695, %v368_v20 }
 0x3e1   :  { %1444 = vpow2.f32 %v1271_v21 }
 0x3e2   :  { %1446 = vpow2.f32 %v1272_v22 }
 0x3eb   :  { %v1445_v23 = vpop.eup %1444 }
 0x3ec   :  { %v1447_v24 = vpop.eup %1446  ;;  %v340_v26 = vadd.f32 1.0, %v1445_v23 }
 0x3ed   :  { %v372_v27 = vadd.f32 1.0, %v1447_v24 }
 0x3ee   :  { %1448 = vrcp.f32 %v340_v26 }
 0x3ef   :  { %1450 = vrcp.f32 %v372_v27 }
 0x3f8   :  { %v1449_v29 = vpop.eup %1448 }
 0x3f9   :  { %v1451_v30 = vpop.eup %1450  ;;  %v353_v50 = vsub.f32 1.0, %v1449_v29 }
 0x3fa   :  { %v385_v44 = vsub.f32 1.0, %v1451_v30 }
 0x44f   :  { %v376_v31 = vpop.permute.xlu1 %375  ;;  %v344_v32 = vpop.permute.xlu0 %343 }
 0x450   :  { %v378_v33 = vmul.f32 %v1451_v30, %v376_v31  ;;  %v346_v34 = vmul.f32 %v1449_v29, %v344_v32 }
 0x452   :  { %380 = vrot.lane.b32.xlu1 %v378_v33, %s1608_s3  ;;  %348 = vrot.lane.b32.xlu0 %v346_v34, %s1608_s3 }
 0x456   :  { %392 = vrot.lane.b32.xlu0 %v391_v35, %s1612_s1 }
 0x45a   :  { %361 = vrot.lane.b32.xlu0 %v360_v36, %s1613_s16 }
 0x4c4   :  { %v381_v37 = vpop.permute.xlu1 %380  ;;  %v349_v38 = vpop.permute.xlu0 %348 }
 0x4c5   :  { %v383_v39 = vadd.f32 %v381_v37, %v1749_v28  ;;  %v351_v40 = vadd.f32 %v349_v38, %v1747_v25 }
 0x4c7   :  { %1452 = vtanh.f32 %v383_v39 }
 0x4c8   :  { %1454 = vtanh.f32 %v351_v40  ;;  %v393_v43 = vpop.permute.xlu0 %392 }
 0x4c9   :  { %v395_v46 = vmul.f32 %v1451_v30, %v393_v43 }
 0x4cc   :  { %v362_v48 = vpop.permute.xlu0 %361 }
 0x4cd   :  { %v364_v52 = vmul.f32 %v1449_v29, %v362_v48 }
 0x4d1   :  { %v1453_v41 = vpop.eup %1452 }
 0x4d2   :  { %387 = vrot.lane.b32.xlu1 %v1453_v41, %s1609_s12  ;;  %v1455_v42 = vpop.eup %1454 }
 0x4d6   :  { %355 = vrot.lane.b32.xlu1 %v1455_v42, %s1609_s12 }
 0x544   :  { %v388_v45 = vpop.permute.xlu1 %387 }
 0x545   :  { %v390_v47 = vmul.f32 %v388_v45, %v385_v44 }
 0x547   :  { %v396_v49 = vadd.f32 %v395_v46, %v390_v47 }
 0x548   :  { %v356_v51 = vpop.permute.xlu1 %355 }
 0x549   :  { %v402_v53 = vrot.slane %v396_v49, 2  ;;  %v358_v54 = vmul.f32 %v356_v51, %v353_v50 }
 0x54b   :  { %v365_v55 = vadd.f32 %v364_v52, %v358_v54  ;;  %403 = vrot.lane.b32.xlu0 %v402_v53, %s1610_s15  ;;  %v1615_v53 = vmov 5  }
 0x54c   :  { %v135_v54 = vsel %vm132_vm5, 2, %v1615_v53 }
 0x54d   :  { %398 = vrot.lane.b32.xlu1 %v365_v55, %s1609_s12  ;;  %vm146_vm12 = vcmp.lt.s32.totalorder %v135_v54, %v1765_v62 }
 0x5bd   :  { %v404_v56 = vpop.permute.xlu0 %403 }
 0x5bf   :  { %v399_v59 = vpop.permute.xlu1 %398 }
 0x5c0   :  { %v406_v60 = vsel %vm281_vm6, %v399_v59, %v404_v56 }
 0x5c1   :  { %v408_v61 = vrot.slane %v406_v60, 2 }
 0x5c3   :  { %v1808_v63 = vsel %vm145_vm11, %v408_v61, %v1771_v8  ;;  %v411_v2 = vsel %vm145_vm11, %v408_v61, 0.0 }
 0x5c4   :  { %413 = vst.msk [vmem:[#allocation5 + $0x2] sm:$0x3] %vm284_vm7, %v411_v2  ;;  %v416_v3 = vpack.c.bf16 %v1808_v63, %v1808_v63  ;;  %v518_v31 = vrot.slane %v1808_v63, 6  ;;  %v487_v32 = vrot.slane %v1808_v63, 4 }
 0x5c5   :  { %415 = vst.msk [vmem:[#allocation5 + $0xc] sm:$0x3] %vm287_vm8, %v411_v2 }
 0x5c6   :  { %1354 = vmatmul.mubr.msk.bf16.vlgmr.msra.gmra.mrb[4].mxu1 %vm175_vm10, %v416_v3 }
 0x5c7   :  { %1366 = vmatpush3.bf16.msra.mxu1 %v1701_v4  ;;  %1369 = vmatprep.mubr.msk.bf16.mxu1 %vm1606_vm0, %v1605_v1 }
 0x5c8   :  { %1367 = vmatprep.subr.bf16.mxu1 %v1605_v1 }
 0x5cb   :  { %1368 = vmatpush3.bf16.msra.mxu1 %v1706_v5 }
 0x5cc   :  { %1381 = vmatprep.subr.bf16.mxu1 %v1605_v1 }
 0x699   :  { %v454_v6 = vpop.f32.mrb[4].mxu1 }
 0x69a   :  { %v455_v7 = vadd.f32 %v1739_v16, %v454_v6  ;;  %v1355_v8 = vpop.f32.mrb[5].mxu1 }
 0x69b   :  { %v457_v9 = vpop.f32.mrb[6].mxu1 }
 0x69c   :  { %v461_v11 = vrot.slane %v455_v7, 4  ;;  %v493_v12 = vrot.slane %v455_v7, 6  ;;  %v1356_v13 = vpop.f32.mrb[7].mxu1 }
 0x69e   :  { %502 = vrot.lane.b32.xlu1 %v493_v12, %s1607_s2  ;;  %470 = vrot.lane.b32.xlu0 %v461_v11, %s1607_s2  ;;  %v463_v14 = vadd.f32 %v461_v11, %v1747_v25  ;;  %v495_v15 = vadd.f32 %v493_v12, %v1749_v28 }
 0x6a0   :  { %v1274_v17 = vmul.f32 -1.442695, %v463_v14  ;;  %v1275_v18 = vmul.f32 -1.442695, %v495_v15 }
 0x6a2   :  { %1456 = vpow2.f32 %v1274_v17 }
 0x6a3   :  { %1458 = vpow2.f32 %v1275_v18 }
 0x6ac   :  { %v1457_v19 = vpop.eup %1456 }
 0x6ad   :  { %v1459_v20 = vpop.eup %1458  ;;  %v467_v21 = vadd.f32 1.0, %v1457_v19 }
 0x6ae   :  { %v499_v22 = vadd.f32 1.0, %v1459_v20 }
 0x6af   :  { %1460 = vrcp.f32 %v467_v21 }
 0x6b0   :  { %1462 = vrcp.f32 %v499_v22 }
 0x6b9   :  { %v1461_v23 = vpop.eup %1460 }
 0x6ba   :  { %v1463_v24 = vpop.eup %1462  ;;  %v480_v46 = vsub.f32 1.0, %v1461_v23 }
 0x6bb   :  { %v512_v40 = vsub.f32 1.0, %v1463_v24 }
 0x710   :  { %v503_v26 = vpop.permute.xlu1 %502  ;;  %v471_v27 = vpop.permute.xlu0 %470 }
 0x711   :  { %v505_v29 = vmul.f32 %v1463_v24, %v503_v26  ;;  %v473_v30 = vmul.f32 %v1461_v23, %v471_v27 }
 0x713   :  { %507 = vrot.lane.b32.xlu1 %v505_v29, %s1608_s3  ;;  %475 = vrot.lane.b32.xlu0 %v473_v30, %s1608_s3 }
 0x717   :  { %519 = vrot.lane.b32.xlu0 %v518_v31, %s1612_s1 }
 0x71b   :  { %488 = vrot.lane.b32.xlu0 %v487_v32, %s1613_s16 }
 0x785   :  { %v508_v33 = vpop.permute.xlu1 %507  ;;  %v476_v34 = vpop.permute.xlu0 %475 }
 0x786   :  { %v510_v35 = vadd.f32 %v508_v33, %v1749_v28  ;;  %v478_v36 = vadd.f32 %v476_v34, %v1747_v25 }
 0x788   :  { %1464 = vtanh.f32 %v510_v35 }
 0x789   :  { %1466 = vtanh.f32 %v478_v36  ;;  %v520_v39 = vpop.permute.xlu0 %519 }
 0x78a   :  { %v522_v42 = vmul.f32 %v1463_v24, %v520_v39 }
 0x78d   :  { %v489_v44 = vpop.permute.xlu0 %488 }
 0x78e   :  { %v491_v48 = vmul.f32 %v1461_v23, %v489_v44 }
 0x792   :  { %v1465_v37 = vpop.eup %1464 }
 0x793   :  { %514 = vrot.lane.b32.xlu1 %v1465_v37, %s1609_s12  ;;  %v1467_v38 = vpop.eup %1466 }
 0x797   :  { %482 = vrot.lane.b32.xlu1 %v1467_v38, %s1609_s12 }
 0x805   :  { %v515_v41 = vpop.permute.xlu1 %514 }
 0x806   :  { %v517_v43 = vmul.f32 %v515_v41, %v512_v40 }
 0x808   :  { %v523_v45 = vadd.f32 %v522_v42, %v517_v43 }
 0x809   :  { %v483_v47 = vpop.permute.xlu1 %482 }
 0x80a   :  { %v529_v49 = vrot.slane %v523_v45, 6  ;;  %v485_v50 = vmul.f32 %v483_v47, %v480_v46  ;;  %v1616_v47 = vmov 4  }
 0x80c   :  { %v492_v51 = vadd.f32 %v491_v48, %v485_v50  ;;  %530 = vrot.lane.b32.xlu0 %v529_v49, %s1610_s15  ;;  %v136_v48 = vsel %vm132_vm5, 3, %v1616_v47 }
 0x80d   :  { %vm147_vm13 = vcmp.lt.s32.totalorder %v136_v48, %v1765_v62 }
 0x80e   :  { %525 = vrot.lane.b32.xlu1 %v492_v51, %s1609_s12 }
 0x87e   :  { %v531_v52 = vpop.permute.xlu0 %530 }
 0x880   :  { %v526_v55 = vpop.permute.xlu1 %525 }
 0x881   :  { %v533_v56 = vsel %vm281_vm6, %v526_v55, %v531_v52 }
 0x882   :  { %v535_v57 = vrot.slane %v533_v56, 4 }
 0x884   :  { %v1843_v58 = vsel %vm146_vm12, %v535_v57, %v1808_v63  ;;  %v538_v59 = vsel %vm146_vm12, %v535_v57, 0.0 }
 0x885   :  { %540 = vst.msk [vmem:[#allocation5 + $0x4] sm:$0x3] %vm284_vm7, %v538_v59  ;;  %v543_v60 = vpack.c.bf16 %v1843_v58, %v1843_v58  ;;  %v614_v24 = vrot.slane %v1843_v58, 2 }
 0x886   :  { %542 = vst.msk [vmem:[#allocation5 + $0xa] sm:$0x3] %vm287_vm8, %v538_v59 }
 0x887   :  { %1362 = vmatmul.mubr.msk.bf16.vlgmr.msra.gmra.mrb[8].mxu0 %vm175_vm10, %v543_v60 }
 0x888   :  { %1374 = vmatpush3.bf16.msra.mxu0 %v1701_v4  ;;  %1377 = vmatprep.mubr.msk.bf16.mxu0 %vm1606_vm0, %v1605_v1 }
 0x889   :  { %1375 = vmatprep.subr.bf16.mxu0 %v1605_v1 }
 0x88c   :  { %1376 = vmatpush3.bf16.msra.mxu0 %v1706_v5 }
 0x88d   :  { %1389 = vmatprep.subr.bf16.mxu0 %v1605_v1 }
 0x95a   :  { %v581_v61 = vpop.f32.mrb[8].mxu0 }
 0x95b   :  { %v582_v63 = vadd.f32 %v1739_v16, %v581_v61  ;;  %v1363_v2 = vpop.f32.mrb[9].mxu0 }
 0x95c   :  { %v584_v3 = vpop.f32.mrb[10].mxu0 }
 0x95d   :  { %627 = vrot.lane.b32.xlu1 %v582_v63, %s1607_s2  ;;  %v1364_v6 = vpop.f32.mrb[11].mxu0  ;;  %v588_v7 = vrot.slane %v582_v63, 2  ;;  %v620_v8 = vadd.f32 %v582_v63, %v1749_v28 }
 0x95f   :  { %597 = vrot.lane.b32.xlu0 %v588_v7, %s1607_s2  ;;  %v590_v9 = vadd.f32 %v588_v7, %v1747_v25  ;;  %v1278_v11 = vmul.f32 -1.442695, %v620_v8 }
 0x961   :  { %v1277_v12 = vmul.f32 -1.442695, %v590_v9  ;;  %1468 = vpow2.f32 %v1278_v11 }
 0x963   :  { %1470 = vpow2.f32 %v1277_v12 }
 0x96b   :  { %v1469_v13 = vpop.eup %1468 }
 0x96c   :  { %v624_v15 = vadd.f32 1.0, %v1469_v13 }
 0x96d   :  { %v1471_v14 = vpop.eup %1470 }
 0x96e   :  { %v594_v17 = vadd.f32 1.0, %v1471_v14  ;;  %1472 = vrcp.f32 %v624_v15 }
 0x970   :  { %1474 = vrcp.f32 %v594_v17 }
 0x978   :  { %v1473_v18 = vpop.eup %1472 }
 0x979   :  { %v637_v34 = vsub.f32 1.0, %v1473_v18 }
 0x97a   :  { %v1475_v21 = vpop.eup %1474 }
 0x97b   :  { %v607_v40 = vsub.f32 1.0, %v1475_v21 }
 0x9cf   :  { %v628_v19 = vpop.permute.xlu1 %627 }
 0x9d0   :  { %v630_v20 = vmul.f32 %v1473_v18, %v628_v19 }
 0x9d1   :  { %v598_v22 = vpop.permute.xlu0 %597 }
 0x9d2   :  { %v600_v23 = vmul.f32 %v1475_v21, %v598_v22  ;;  %632 = vrot.lane.b32.xlu1 %v630_v20, %s1608_s3 }
 0x9d4   :  { %602 = vrot.lane.b32.xlu0 %v600_v23, %s1608_s3 }
 0x9d8   :  { %643 = vrot.lane.b32.xlu0 %v1843_v58, %s1612_s1 }
 0x9dc   :  { %615 = vrot.lane.b32.xlu0 %v614_v24, %s1613_s16 }
 0xa44   :  { %v633_v26 = vpop.permute.xlu1 %632 }
 0xa45   :  { %v635_v27 = vadd.f32 %v633_v26, %v1749_v28 }
 0xa46   :  { %v603_v29 = vpop.permute.xlu0 %602 }
 0xa47   :  { %1476 = vtanh.f32 %v635_v27  ;;  %v605_v30 = vadd.f32 %v603_v29, %v1747_v25 }
 0xa49   :  { %1478 = vtanh.f32 %v605_v30 }
 0xa4a   :  { %v644_v33 = vpop.permute.xlu0 %643 }
 0xa4b   :  { %v646_v36 = vmul.f32 %v1473_v18, %v644_v33 }
 0xa4e   :  { %v616_v38 = vpop.permute.xlu0 %615 }
 0xa4f   :  { %v618_v42 = vmul.f32 %v1475_v21, %v616_v38 }
 0xa51   :  { %v1477_v31 = vpop.eup %1476 }
 0xa52   :  { %639 = vrot.lane.b32.xlu1 %v1477_v31, %s1609_s12 }
 0xa53   :  { %v1479_v32 = vpop.eup %1478 }
 0xa56   :  { %609 = vrot.lane.b32.xlu1 %v1479_v32, %s1609_s12 }
 0xac4   :  { %v640_v35 = vpop.permute.xlu1 %639 }
 0xac5   :  { %v642_v37 = vmul.f32 %v640_v35, %v637_v34 }
 0xac7   :  { %v647_v39 = vadd.f32 %v646_v36, %v642_v37 }
 0xac8   :  { %v610_v41 = vpop.permute.xlu1 %609 }
 0xac9   :  { %v653_v43 = vrot.slane %v647_v39, 2  ;;  %v612_v44 = vmul.f32 %v610_v41, %v607_v40  ;;  %v1617_v40 = vmov 3  }
 0xaca   :  { %v137_v41 = vsel %vm132_vm5, 4, %v1617_v40 }
 0xacb   :  { %v619_v45 = vadd.f32 %v618_v42, %v612_v44  ;;  %654 = vrot.lane.b32.xlu0 %v653_v43, %s1610_s15  ;;  %vm148_vm14 = vcmp.lt.s32.totalorder %v137_v41, %v1765_v62 }
 0xacd   :  { %649 = vrot.lane.b32.xlu1 %v619_v45, %s1609_s12 }
 0xb3d   :  { %v655_v46 = vpop.permute.xlu0 %654 }
 0xb3f   :  { %v650_v49 = vpop.permute.xlu1 %649 }
 0xb40   :  { %v657_v50 = vsel %vm281_vm6, %v650_v49, %v655_v46 }
 0xb41   :  { %v659_v51 = vrot.slane %v657_v50, 6 }
 0xb43   :  { %v1878_v52 = vsel %vm147_vm13, %v659_v51, %v1843_v58  ;;  %v662_v53 = vsel %vm147_vm13, %v659_v51, 0.0 }
 0xb44   :  { %664 = vst.msk [vmem:[#allocation5 + $0x6] sm:$0x3] %vm284_vm7, %v662_v53  ;;  %v667_v54 = vpack.c.bf16 %v1878_v52, %v1878_v52  ;;  %v766_v18 = vrot.slane %v1878_v52, 2 }
 0xb45   :  { %666 = vst.msk [vmem:[#allocation5 + $0x8] sm:$0x3] %vm287_vm8, %v662_v53 }
 0xb46   :  { %1370 = vmatmul.mubr.msk.bf16.vlgmr.msra.gmra.mrb[8].mxu1 %vm175_vm10, %v667_v54 }
 0xb47   :  { %1382 = vmatpush3.bf16.msra.mxu1 %v1701_v4  ;;  %1385 = vmatprep.mubr.msk.bf16.mxu1 %vm1606_vm0, %v1605_v1 }
 0xb48   :  { %1383 = vmatprep.subr.bf16.mxu1 %v1605_v1 }
 0xb4b   :  { %1384 = vmatpush3.bf16.msra.mxu1 %v1706_v5 }
 0xb4c   :  { %1397 = vmatprep.subr.bf16.mxu1 %v1605_v1 }
 0xc19   :  { %v705_v55 = vpop.f32.mrb[8].mxu1 }
 0xc1a   :  { %v706_v56 = vadd.f32 %v1739_v16, %v705_v55  ;;  %v1371_v57 = vpop.f32.mrb[9].mxu1 }
 0xc1b   :  { %v708_v58 = vpop.f32.mrb[10].mxu1 }
 0xc1c   :  { %719 = vrot.lane.b32.xlu0 %v706_v56, %s1607_s2  ;;  %v1372_v59 = vpop.f32.mrb[11].mxu1  ;;  %v741_v60 = vrot.slane %v706_v56, 2  ;;  %v711_v61 = vadd.f32 %v706_v56, %v1749_v28 }
 0xc1e   :  { %750 = vrot.lane.b32.xlu1 %v741_v60, %s1607_s2  ;;  %v743_v63 = vadd.f32 %v741_v60, %v1747_v25  ;;  %v1280_v2 = vmul.f32 -1.442695, %v711_v61 }
 0xc20   :  { %v1281_v3 = vmul.f32 -1.442695, %v743_v63  ;;  %1480 = vpow2.f32 %v1280_v2 }
 0xc22   :  { %1482 = vpow2.f32 %v1281_v3 }
 0xc2a   :  { %v1481_v6 = vpop.eup %1480 }
 0xc2b   :  { %v715_v8 = vadd.f32 1.0, %v1481_v6 }
 0xc2c   :  { %v1483_v7 = vpop.eup %1482 }
 0xc2d   :  { %v747_v9 = vadd.f32 1.0, %v1483_v7  ;;  %1484 = vrcp.f32 %v715_v8 }
 0xc2f   :  { %1486 = vrcp.f32 %v747_v9 }
 0xc37   :  { %v1485_v11 = vpop.eup %1484 }
 0xc38   :  { %v729_v34 = vsub.f32 1.0, %v1485_v11 }
 0xc39   :  { %v1487_v14 = vpop.eup %1486 }
 0xc3a   :  { %v760_v27 = vsub.f32 1.0, %v1487_v14 }
 0xc8e   :  { %v720_v12 = vpop.permute.xlu0 %719 }
 0xc8f   :  { %v722_v13 = vmul.f32 %v1485_v11, %v720_v12 }
 0xc90   :  { %v751_v15 = vpop.permute.xlu1 %750 }
 0xc91   :  { %v753_v17 = vmul.f32 %v1487_v14, %v751_v15  ;;  %724 = vrot.lane.b32.xlu0 %v722_v13, %s1608_s3 }
 0xc93   :  { %755 = vrot.lane.b32.xlu1 %v753_v17, %s1608_s3 }
 0xc95   :  { %767 = vrot.lane.b32.xlu0 %v766_v18, %s1612_s1 }
 0xc99   :  { %736 = vrot.lane.b32.xlu0 %v1878_v52, %s1613_s16 }
 0xd03   :  { %v725_v19 = vpop.permute.xlu0 %724 }
 0xd04   :  { %v727_v22 = vadd.f32 %v725_v19, %v1749_v28 }
 0xd05   :  { %v756_v20 = vpop.permute.xlu1 %755 }
 0xd06   :  { %v758_v21 = vadd.f32 %v756_v20, %v1747_v25 }
 0xd07   :  { %v768_v26 = vpop.permute.xlu0 %767 }
 0xd08   :  { %1488 = vtanh.f32 %v758_v21  ;;  %v770_v30 = vmul.f32 %v1487_v14, %v768_v26 }
 0xd09   :  { %1490 = vtanh.f32 %v727_v22 }
 0xd0b   :  { %v737_v32 = vpop.permute.xlu0 %736 }
 0xd0c   :  { %v739_v36 = vmul.f32 %v1485_v11, %v737_v32 }
 0xd12   :  { %v1489_v23 = vpop.eup %1488 }
 0xd13   :  { %762 = vrot.lane.b32.xlu1 %v1489_v23, %s1609_s12  ;;  %v1491_v24 = vpop.eup %1490 }
 0xd17   :  { %731 = vrot.lane.b32.xlu1 %v1491_v24, %s1609_s12 }
 0xd85   :  { %v763_v29 = vpop.permute.xlu1 %762 }
 0xd86   :  { %v765_v31 = vmul.f32 %v763_v29, %v760_v27 }
 0xd88   :  { %v771_v33 = vadd.f32 %v770_v30, %v765_v31 }
 0xd89   :  { %v732_v35 = vpop.permute.xlu1 %731 }
 0xd8a   :  { %v777_v37 = vrot.slane %v771_v33, 6  ;;  %v734_v38 = vmul.f32 %v732_v35, %v729_v34  ;;  %v1618_v34 = vmov 2  }
 0xd8b   :  { %v138_v35 = vsel %vm132_vm5, 5, %v1618_v34 }
 0xd8c   :  { %v740_v39 = vadd.f32 %v739_v36, %v734_v38  ;;  %778 = vrot.lane.b32.xlu0 %v777_v37, %s1610_s15  ;;  %vm149_vm15 = vcmp.lt.s32.totalorder %v138_v35, %v1765_v62 }
 0xd8e   :  { %773 = vrot.lane.b32.xlu1 %v740_v39, %s1609_s12 }
 0xdfe   :  { %v779_v42 = vpop.permute.xlu0 %778 }
 0xe00   :  { %v774_v43 = vpop.permute.xlu1 %773 }
 0xe01   :  { %v781_v44 = vsel %vm281_vm6, %v774_v43, %v779_v42 }
 0xe02   :  { %v1913_v45 = vsel %vm148_vm14, %v781_v44, %v1878_v52  ;;  %v783_v46 = vsel %vm148_vm14, %v781_v44, 0.0 }
 0xe03   :  { %784 = vst.msk [vmem:[#allocation5 + $0x8] sm:$0x3] %vm284_vm7, %v783_v46  ;;  %v786_v47 = vpack.c.bf16 %v1913_v45, %v1913_v45  ;;  %v888_v8 = vrot.slane %v1913_v45, 4  ;;  %v857_v9 = vrot.slane %v1913_v45, 6 }
 0xe04   :  { %785 = vst.msk [vmem:[#allocation5 + $0x6] sm:$0x3] %vm287_vm8, %v783_v46 }
 0xe05   :  { %1378 = vmatmul.mubr.msk.bf16.vlgmr.msra.gmra.mrb[12].mxu0 %vm175_vm10, %v786_v47 }
 0xe06   :  { %1390 = vmatpush3.bf16.msra.mxu0 %v1701_v4  ;;  %1393 = vmatprep.mubr.msk.bf16.mxu0 %vm1606_vm0, %v1605_v1 }
 0xe07   :  { %1391 = vmatprep.subr.bf16.mxu0 %v1605_v1 }
 0xe0a   :  { %1392 = vmatpush3.bf16.msra.mxu0 %v1706_v5 }
 0xed8   :  { %v824_v48 = vpop.f32.mrb[12].mxu0 }
 0xed9   :  { %v825_v49 = vadd.f32 %v1739_v16, %v824_v48  ;;  %v1379_v50 = vpop.f32.mrb[13].mxu0 }
 0xeda   :  { %v827_v51 = vpop.f32.mrb[14].mxu0 }
 0xedb   :  { %v831_v52 = vrot.slane %v825_v49, 6  ;;  %v863_v53 = vrot.slane %v825_v49, 4  ;;  %v1380_v54 = vpop.f32.mrb[15].mxu0 }
 0xedd   :  { %872 = vrot.lane.b32.xlu1 %v863_v53, %s1607_s2  ;;  %840 = vrot.lane.b32.xlu0 %v831_v52, %s1607_s2  ;;  %v833_v4 = vadd.f32 %v831_v52, %v1749_v28  ;;  %v865_v55 = vadd.f32 %v863_v53, %v1747_v25 }
 0xedf   :  { %v1283_v56 = vmul.f32 -1.442695, %v833_v4  ;;  %v1284_v57 = vmul.f32 -1.442695, %v865_v55 }
 0xee1   :  { %1492 = vpow2.f32 %v1283_v56 }
 0xee2   :  { %1494 = vpow2.f32 %v1284_v57 }
 0xeeb   :  { %v1493_v5 = vpop.eup %1492 }
 0xeec   :  { %v1495_v58 = vpop.eup %1494  ;;  %v837_v59 = vadd.f32 1.0, %v1493_v5 }
 0xeed   :  { %v869_v60 = vadd.f32 1.0, %v1495_v58 }
 0xeee   :  { %1496 = vrcp.f32 %v837_v59 }
 0xeef   :  { %1498 = vrcp.f32 %v869_v60 }
 0xef8   :  { %v1497_v61 = vpop.eup %1496 }
 0xef9   :  { %v1499_v63 = vpop.eup %1498  ;;  %v850_v26 = vsub.f32 1.0, %v1497_v61 }
 0xefa   :  { %v882_v19 = vsub.f32 1.0, %v1499_v63 }
 0xf4f   :  { %v873_v2 = vpop.permute.xlu1 %872  ;;  %v841_v3 = vpop.permute.xlu0 %840 }
 0xf50   :  { %v875_v6 = vmul.f32 %v1499_v63, %v873_v2  ;;  %v843_v7 = vmul.f32 %v1497_v61, %v841_v3 }
 0xf52   :  { %877 = vrot.lane.b32.xlu1 %v875_v6, %s1608_s3  ;;  %845 = vrot.lane.b32.xlu0 %v843_v7, %s1608_s3 }
 0xf56   :  { %889 = vrot.lane.b32.xlu0 %v888_v8, %s1612_s1 }
 0xf5a   :  { %858 = vrot.lane.b32.xlu0 %v857_v9, %s1613_s16 }
 0xfc4   :  { %v878_v11 = vpop.permute.xlu1 %877  ;;  %v846_v12 = vpop.permute.xlu0 %845 }
 0xfc5   :  { %v880_v13 = vadd.f32 %v878_v11, %v1747_v25  ;;  %v848_v14 = vadd.f32 %v846_v12, %v1749_v28 }
 0xfc7   :  { %1500 = vtanh.f32 %v880_v13 }
 0xfc8   :  { %1502 = vtanh.f32 %v848_v14  ;;  %v890_v18 = vpop.permute.xlu0 %889 }
 0xfc9   :  { %v892_v21 = vmul.f32 %v1499_v63, %v890_v18 }
 0xfcc   :  { %v859_v23 = vpop.permute.xlu0 %858 }
 0xfcd   :  { %v861_v29 = vmul.f32 %v1497_v61, %v859_v23 }
 0xfd1   :  { %v1501_v15 = vpop.eup %1500 }
 0xfd2   :  { %884 = vrot.lane.b32.xlu1 %v1501_v15, %s1609_s12  ;;  %v1503_v17 = vpop.eup %1502 }
 0xfd6   :  { %852 = vrot.lane.b32.xlu1 %v1503_v17, %s1609_s12 }
0x1044   :  { %v885_v20 = vpop.permute.xlu1 %884 }
0x1045   :  { %v887_v22 = vmul.f32 %v885_v20, %v882_v19 }
0x1047   :  { %v893_v24 = vadd.f32 %v892_v21, %v887_v22 }
0x1048   :  { %v853_v27 = vpop.permute.xlu1 %852 }
0x1049   :  { %v899_v30 = vrot.slane %v893_v24, 2  ;;  %v855_v31 = vmul.f32 %v853_v27, %v850_v26  ;;  %v1619_v26 = vmov 1  }
0x104a   :  { %v139_v27 = vsel %vm132_vm5, 6, %v1619_v26 }
0x104b   :  { %v862_v32 = vadd.f32 %v861_v29, %v855_v31  ;;  %900 = vrot.lane.b32.xlu0 %v899_v30, %s1610_s15 }
0x104d   :  { %895 = vrot.lane.b32.xlu1 %v862_v32, %s1609_s12 }
0x10bd   :  { %v901_v33 = vpop.permute.xlu0 %900 }
0x10bf   :  { %v896_v36 = vpop.permute.xlu1 %895 }
0x10c0   :  { %v903_v37 = vsel %vm281_vm6, %v896_v36, %v901_v33  ;;  %v1530_v36 = vld [vmem:[#allocation2] ss:$0 sm:$0xff] }
0x10c1   :  { %v905_v38 = vrot.slane %v903_v37, 2 }
0x10c3   :  { %v1947_v39 = vsel %vm149_vm15, %v905_v38, %v1913_v45  ;;  %v908_v40 = vsel %vm149_vm15, %v905_v38, 0.0 }
0x10c4   :  { %909 = vst.msk [vmem:[#allocation5 + $0xa] sm:$0x3] %vm284_vm7, %v908_v40  ;;  %v911_v41 = vpack.c.bf16 %v1947_v39, %v1947_v39  ;;  %v1013_v60 = vrot.slane %v1947_v39, 6  ;;  %v982_v61 = vrot.slane %v1947_v39, 4 }
0x10c5   :  { %910 = vst.msk [vmem:[#allocation5 + $0x4] sm:$0x3] %vm287_vm8, %v908_v40 }
0x10c6   :  { %1386 = vmatmul.mubr.msk.bf16.vlgmr.msra.gmra.mrb[12].mxu1 %vm175_vm10, %v911_v41 }
0x10c7   :  { %1401 = vmatprep.mubr.msk.bf16.mxu1 %vm1606_vm0, %v1605_v1  ;;  %vm150_vm0 = vcmp.lt.s32.totalorder %v139_v27, %v1765_v62 }
0x1199   :  { %v949_v42 = vpop.f32.mrb[12].mxu1 }
0x119a   :  { %v950_v43 = vadd.f32 %v1739_v16, %v949_v42  ;;  %v1387_v44 = vpop.f32.mrb[13].mxu1 }
0x119b   :  { %v952_v46 = vpop.f32.mrb[14].mxu1 }
0x119c   :  { %v956_v45 = vrot.slane %v950_v43, 4  ;;  %v988_v47 = vrot.slane %v950_v43, 6  ;;  %v1388_v48 = vpop.f32.mrb[15].mxu1 }
0x119e   :  { %997 = vrot.lane.b32.xlu1 %v988_v47, %s1607_s2  ;;  %965 = vrot.lane.b32.xlu0 %v956_v45, %s1607_s2  ;;  %v958_v49 = vadd.f32 %v956_v45, %v1749_v28  ;;  %v990_v50 = vadd.f32 %v988_v47, %v1747_v25 }
0x11a0   :  { %v1286_v51 = vmul.f32 -1.442695, %v958_v49  ;;  %v1287_v52 = vmul.f32 -1.442695, %v990_v50 }
0x11a2   :  { %1504 = vpow2.f32 %v1286_v51 }
0x11a3   :  { %1506 = vpow2.f32 %v1287_v52 }
0x11ac   :  { %v1505_v53 = vpop.eup %1504 }
0x11ad   :  { %v1507_v54 = vpop.eup %1506  ;;  %v962_v16 = vadd.f32 1.0, %v1505_v53 }
0x11ae   :  { %v994_v4 = vadd.f32 1.0, %v1507_v54 }
0x11af   :  { %1508 = vrcp.f32 %v962_v16 }
0x11b0   :  { %1510 = vrcp.f32 %v994_v4 }
0x11b9   :  { %v1509_v55 = vpop.eup %1508 }
0x11ba   :  { %v1511_v56 = vpop.eup %1510  ;;  %v975_v18 = vsub.f32 1.0, %v1509_v55 }
0x11bb   :  { %v1007_v11 = vsub.f32 1.0, %v1511_v56 }
0x1210   :  { %v998_v57 = vpop.permute.xlu1 %997  ;;  %v966_v5 = vpop.permute.xlu0 %965 }
0x1211   :  { %v1000_v58 = vmul.f32 %v1511_v56, %v998_v57  ;;  %v968_v59 = vmul.f32 %v1509_v55, %v966_v5 }
0x1213   :  { %1002 = vrot.lane.b32.xlu1 %v1000_v58, %s1608_s3  ;;  %970 = vrot.lane.b32.xlu0 %v968_v59, %s1608_s3 }
0x1217   :  { %1014 = vrot.lane.b32.xlu0 %v1013_v60, %s1612_s1  ;;  %v1430_v60 = vld [vmem:[%s2052_s6] sm:$0xff]  }
0x1218   :  { %1398 = vmatpush3.bf16.msra.mxu1 %v1430_v60 }
0x1219   :  { %1399 = vmatprep.subr.bf16.mxu1 %v1605_v1  ;;  %v140_v1 = vsel %vm132_vm5, 7, %v1604_v0 }
0x121a   :  { %vm151_vm1 = vcmp.lt.s32.totalorder %v140_v1, %v1765_v62 }
0x121b   :  { %983 = vrot.lane.b32.xlu0 %v982_v61, %s1613_s16 }
0x1285   :  { %v1003_v63 = vpop.permute.xlu1 %1002  ;;  %v971_v2 = vpop.permute.xlu0 %970 }
0x1286   :  { %v1005_v3 = vadd.f32 %v1003_v63, %v1747_v25  ;;  %v973_v6 = vadd.f32 %v971_v2, %v1749_v28 }
0x1288   :  { %1512 = vtanh.f32 %v1005_v3 }
0x1289   :  { %1514 = vtanh.f32 %v973_v6  ;;  %v1015_v9 = vpop.permute.xlu0 %1014 }
0x128a   :  { %v1017_v13 = vmul.f32 %v1511_v56, %v1015_v9 }
0x128d   :  { %v984_v15 = vpop.permute.xlu0 %983 }
0x128e   :  { %v986_v20 = vmul.f32 %v1509_v55, %v984_v15 }
0x1292   :  { %v1513_v7 = vpop.eup %1512 }
0x1293   :  { %1009 = vrot.lane.b32.xlu1 %v1513_v7, %s1609_s12  ;;  %v1515_v8 = vpop.eup %1514 }
0x1297   :  { %977 = vrot.lane.b32.xlu1 %v1515_v8, %s1609_s12 }
0x1305   :  { %v1010_v12 = vpop.permute.xlu1 %1009 }
0x1306   :  { %v1012_v14 = vmul.f32 %v1010_v12, %v1007_v11 }
0x1308   :  { %v1018_v17 = vadd.f32 %v1017_v13, %v1012_v14 }
0x1309   :  { %v978_v19 = vpop.permute.xlu1 %977 }
0x130a   :  { %v1024_v21 = vrot.slane %v1018_v17, 6  ;;  %v980_v22 = vmul.f32 %v978_v19, %v975_v18 }
0x130c   :  { %v987_v23 = vadd.f32 %v986_v20, %v980_v22  ;;  %1025 = vrot.lane.b32.xlu0 %v1024_v21, %s1610_s15 }
0x130e   :  { %1020 = vrot.lane.b32.xlu1 %v987_v23, %s1609_s12 }
0x137e   :  { %v1026_v24 = vpop.permute.xlu0 %1025 }
0x1380   :  { %v1021_v29 = vpop.permute.xlu1 %1020 }
0x1381   :  { %v1028_v30 = vsel %vm281_vm6, %v1021_v29, %v1026_v24 }
0x1382   :  { %v1030_v31 = vrot.slane %v1028_v30, 4 }
0x1384   :  { %v1978_v32 = vsel %vm150_vm0, %v1030_v31, %v1947_v39  ;;  %v1033_v33 = vsel %vm150_vm0, %v1030_v31, 0.0 }
0x1385   :  { %1034 = vst.msk [vmem:[#allocation5 + $0xc] sm:$0x3] %vm284_vm7, %v1033_v33  ;;  %v1036_v34 = vpack.c.bf16 %v1978_v32, %v1978_v32  ;;  %v1107_v4 = vrot.slane %v1978_v32, 2 }
0x1386   :  { %1035 = vst.msk [vmem:[#allocation5 + $0x2] sm:$0x3] %vm287_vm8, %v1033_v33 }
0x1387   :  { %1394 = vmatmul.mubr.msk.bf16.vlgmr.msra.gmra.mrb[16].mxu0 %vm175_vm10, %v1036_v34 }
0x145a   :  { %v1074_v35 = vpop.f32.mrb[16].mxu0 }
0x145b   :  { %v1075_v37 = vadd.f32 %v1530_v36, %v1074_v35  ;;  %v1395_v38 = vpop.f32.mrb[17].mxu0 }
0x145c   :  { %v1077_v40 = vpop.f32.mrb[18].mxu0 }
0x145d   :  { %1120 = vrot.lane.b32.xlu1 %v1075_v37, %s1607_s2  ;;  %v1396_v41 = vpop.f32.mrb[19].mxu0  ;;  %v1081_v39 = vrot.slane %v1075_v37, 2  ;;  %v1113_v42 = vadd.f32 %v1075_v37, %v1747_v25 }
0x145f   :  { %1090 = vrot.lane.b32.xlu0 %v1081_v39, %s1607_s2  ;;  %v1083_v43 = vadd.f32 %v1081_v39, %v1749_v28  ;;  %v1290_v44 = vmul.f32 -1.442695, %v1113_v42 }
0x1461   :  { %v1289_v46 = vmul.f32 -1.442695, %v1083_v43  ;;  %1516 = vpow2.f32 %v1290_v44 }
0x1463   :  { %1518 = vpow2.f32 %v1289_v46 }
0x146b   :  { %v1517_v45 = vpop.eup %1516 }
0x146c   :  { %v1117_v48 = vadd.f32 1.0, %v1517_v45 }
0x146d   :  { %v1519_v47 = vpop.eup %1518 }
0x146e   :  { %v1087_v49 = vadd.f32 1.0, %v1519_v47  ;;  %1520 = vrcp.f32 %v1117_v48 }
0x1470   :  { %1522 = vrcp.f32 %v1087_v49 }
0x1478   :  { %v1521_v50 = vpop.eup %1520 }
0x147a   :  { %v1523_v53 = vpop.eup %1522 }
0x147b   :  { %v1100_v8 = vsub.f32 1.0, %v1523_v53 }
0x14cf   :  { %v1121_v51 = vpop.permute.xlu1 %1120 }
0x14d0   :  { %v1123_v52 = vmul.f32 %v1521_v50, %v1121_v51 }
0x14d1   :  { %v1091_v54 = vpop.permute.xlu0 %1090 }
0x14d2   :  { %v1093_v16 = vmul.f32 %v1523_v53, %v1091_v54  ;;  %1125 = vrot.lane.b32.xlu1 %v1123_v52, %s1608_s3 }
0x14d4   :  { %1095 = vrot.lane.b32.xlu0 %v1093_v16, %s1608_s3 }
0x14d8   :  { %1136 = vrot.lane.b32.xlu0 %v1978_v32, %s1612_s1 }
0x14dc   :  { %1108 = vrot.lane.b32.xlu0 %v1107_v4, %s1613_s16 }
0x1544   :  { %v1126_v55 = vpop.permute.xlu1 %1125 }
0x1545   :  { %v1128_v56 = vadd.f32 %v1126_v55, %v1747_v25  ;;  %v1431_v25 = vld [vmem:[%s2052_s6 + $0x8] sm:$0xff]   ;;  %s1620_s6 = smov [#allocation5]  }
0x1546   :  { %v1096_v57 = vpop.permute.xlu0 %1095  ;;  %1400 = vmatpush3.bf16.msra.mxu1 %v1431_v25  ;;  %s1233_s21 = sshll.u32 %s1620_s6, 4  ;;  %s1234_s21 = int_to_ptr.vmem [resolvable:$true] %s1233_s21 }
0x1547   :  { %1524 = vtanh.f32 %v1128_v56  ;;  %v1098_v5 = vadd.f32 %v1096_v57, %v1749_v28  ;;  %v1130_v28 = vsub.f32 1.0, %v1521_v50  ;;  %s1553_s22 = scalar_lea.vmem %s1234_s21, 256  ;;  %p1558_p9 = scmp.lt.s32.totalorder %s1234_s21, %s1234_s21 }
0x1548   :  { %p1554_p8 = scmp.ne.s32.totalorder %s1234_s21, %s1553_s22  ;;  %p1559_p10 = scmp.lt.s32.totalorder %s1553_s22, %s1553_s22 }
0x1549   :  { %1526 = vtanh.f32 %v1098_v5 }
0x154a   :  { %v1137_v61 = vpop.permute.xlu0 %1136  ;;  %p1560_p11 = por %p1559_p10, %p1558_p9 }
0x154b   :  { %v1139_v2 = vmul.f32 %v1521_v50, %v1137_v61 }
0x154c   :  { %p1561_p12 = pnand %p1560_p11, %p1554_p8 }
0x154e   :  { %v1109_v6 = vpop.permute.xlu0 %1108 }
0x154f   :  { %v1111_v11 = vmul.f32 %v1523_v53, %v1109_v6 }
0x1551   :  { %v1525_v58 = vpop.eup %1524 }
0x1552   :  { %1132 = vrot.lane.b32.xlu1 %v1525_v58, %s1609_s12 }
0x1553   :  { %v1527_v59 = vpop.eup %1526 }
0x1556   :  { %1102 = vrot.lane.b32.xlu1 %v1527_v59, %s1609_s12 }
0x15c4   :  { %v1133_v63 = vpop.permute.xlu1 %1132 }
0x15c5   :  { %v1135_v3 = vmul.f32 %v1133_v63, %v1130_v28 }
0x15c7   :  { %v1140_v7 = vadd.f32 %v1139_v2, %v1135_v3 }
0x15c8   :  { %v1103_v9 = vpop.permute.xlu1 %1102 }
0x15c9   :  { %v1146_v12 = vrot.slane %v1140_v7, 2  ;;  %v1105_v13 = vmul.f32 %v1103_v9, %v1100_v8 }
0x15cb   :  { %v1112_v14 = vadd.f32 %v1111_v11, %v1105_v13  ;;  %1147 = vrot.lane.b32.xlu0 %v1146_v12, %s1610_s15 }
0x15cd   :  { %1142 = vrot.lane.b32.xlu1 %v1112_v14, %s1609_s12 }
0x163d   :  { %v1148_v15 = vpop.permute.xlu0 %1147 }
0x163f   :  { %v1143_v17 = vpop.permute.xlu1 %1142 }
0x1640   :  { %v1150_v18 = vsel %vm281_vm6, %v1143_v17, %v1148_v15 }
0x1641   :  { %v1152_v19 = vrot.slane %v1150_v18, 6 }
0x1643   :  { %v1154_v20 = vsel %vm151_vm1, %v1152_v19, %v1978_v32  ;;  %v1155_v21 = vsel %vm151_vm1, %v1152_v19, 0.0 }
0x1644   :  { %1156 = vst.msk [vmem:[#allocation5 + $0xe] sm:$0x3] %vm284_vm7, %v1155_v21  ;;  %v1158_v22 = vpack.c.bf16 %v1154_v20, %v1154_v20 }
0x1645   :  { %1157 = vst.msk [vmem:[#allocation5] sm:$0x3] %vm287_vm8, %v1155_v21 }
0x1646   :  { %1402 = vmatmul.mubr.msk.bf16.vlgmr.msra.gmra.mrb[16].mxu1 %vm175_vm10, %v1158_v22 }
0x1647   :  { %1564 = shalt.err (!%p1561_p12)
}
0x1648   :  { %s1565_s24 = scalar_lea.hbm %s2054_s8, 256 }
0x1649   :  { %p1566_p13 = scmp.ne.s32.totalorder %s2054_s8, %s1565_s24  ;;  %p1569_p0 = scmp.lt.u32.totalorder %s1565_s24, %s2054_s8 }
0x164b   :  { %p1571_p1 = pnand %p1569_p0, %p1566_p13 }
0x164d   :  { %1574 = shalt.err (!%p1571_p1)
}
0x164e   :  { %s1621_s29 = smov 2   ;;  %v1291_v0 = vld [vmem:[%s2053_s7] ss:$0 sm:$0xff]  ;;  %s1622_s4 = smov [#allocation6]   ;;  %vm1226_vm2 = vcmask 254976  }
0x164f   :  { %1239 = dma.vmem_to_hbm [thread:$0]  %s1234_s21, 256, %s2054_s8, [#allocation4], %s1608_s3, %s1608_s3, %s1621_s29  }
0x1650   :  { %s1246_s11 = sshll.u32 %s1622_s4, 4  ;;  %s1247_s11 = int_to_ptr.vmem [resolvable:$true] %s1246_s11 }
0x1651   :  { %s1575_s12 = scalar_lea.vmem %s1247_s11, 32  ;;  %p1580_p3 = scmp.lt.s32.totalorder %s1247_s11, %s1247_s11 }
0x1652   :  { %p1576_p2 = scmp.ne.s32.totalorder %s1247_s11, %s1575_s12  ;;  %p1581_p4 = scmp.lt.s32.totalorder %s1575_s12, %s1575_s12 }
0x1654   :  { %p1582_p5 = por %p1581_p4, %p1580_p3 }
0x1656   :  { %p1583_p6 = pnand %p1582_p5, %p1576_p2 }
0x1719   :  { %v1219_v10 = vpop.f32.mrb[16].mxu1 }
0x171a   :  { %v1220_v62 = vadd.f32 %v1291_v0, %v1219_v10  ;;  %v1403_v23 = vpop.f32.mrb[17].mxu1 }
0x171b   :  { %v1222_v24 = vpop.f32.mrb[18].mxu1 }
0x171c   :  { %1528 = vtanh.f32 %v1220_v62  ;;  %v1404_v26 = vpop.f32.mrb[19].mxu1 }
0x1726   :  { %v1529_v27 = vpop.eup %1528 }
0x1727   :  { %1227 = vst.msk [vmem:[#allocation6] sm:$0x3] %vm1226_vm2, %v1529_v27 }
0x1728   :  { %1586 = shalt.err (!%p1583_p6)
}
0x1729   :  { %s1587_s3 = scalar_lea.hbm %s2055_s9, 32 }
0x172a   :  { %p1588_p7 = scmp.ne.s32.totalorder %s2055_s9, %s1587_s3  ;;  %p1591_p8 = scmp.lt.u32.totalorder %s1587_s3, %s2055_s9 }
0x172c   :  { %p1593_p9 = pnand %p1591_p8, %p1588_p7 }
0x172e   :  { %1596 = shalt.err (!%p1593_p9)
}
0x172f   :  { %1249 = dma.vmem_to_hbm [thread:$0]  %s1247_s11, 32, %s2055_s9, [#allocation7]  }
0x1730   :  { %1599 = dma.done.wait [#allocation4], 256  }
0x1731   :  { %1600 = vsyncadd [#allocation4], 4294967040 }
0x1732   :  { %1601 = dma.done.wait [#allocation7], 32  }
0x1733   :  { %1602 = vsyncadd [#allocation7], 4294967264 }
0x1734   :  { %1256 = vsyncpa [#allocation3], 1 }
0x1735   :  { %1257 = vsyncpa [#allocation4], 1 }
0x1736   :  { %1258 = vsyncpa [#allocation7], 1 }

</bundles_post_ra>
